<compile_context>
chip_gen: v7x
topology: tpu7x:2x2x1
jax: 0.10.0
libtpu: 0.0.40
codegen_flags: <defaults>
</compile_context>

<pallas_src>
import math

import jax
import jax.numpy as jnp
from jax.experimental import pallas as pl
from jax.experimental.pallas import tpu as pltpu

# ---- hyper-params: d_model / num_heads from the spec; batch/seq/ffn scaled down
BATCH = 2
SEQ = 8
D_MODEL = 128                     # spec d_model  -> lane-dense last dim
NUM_HEADS = 8                     # spec num_heads
HEAD_DIM = D_MODEL // NUM_HEADS   # 16
FFN_HIDDEN = 256                  # scaled-down spec ffn_hidden (=2048), multiple of 256
BS = BATCH * SEQ                  # flattened row count
EPS = 1e-5


# ------------------------------------------------------------------------------
# Fused encoder-layer kernel: operates on the whole (B*S, D) activation slab.
#   wqkv : (D, 3D) bf16, columns [ all-Q | all-K | all-V ], Q columns pre-scaled
#   bqkv : (1, 3D) f32 (Q part pre-scaled)
#   wo   : (D, D)  bf16;  w1: (D, F) bf16;  w2: (F, D) bf16
#   bias_ref : (BS, BS) f32 block-diagonal additive mask (0 / -1e9) so the
#              batch dimension can ride inside one score tile.
# ------------------------------------------------------------------------------
def encoder_layer_kernel(
    x_ref, bias_ref,
    wqkv_ref, bqkv_ref, wo_ref, bo_ref,
    g1_ref, be1_ref,
    w1_ref, b1_ref, w2_ref, b2_ref,
    g2_ref, be2_ref,
    o_ref,
):
    x = x_ref[...]                                  # (BS, D) f32
    x_bf = x.astype(jnp.bfloat16)

    # ---- fused QKV projection: one lane-dense MXU pass (BS,D)@(D,3D) ----
    qkv = jnp.dot(x_bf, wqkv_ref[...],
                  preferred_element_type=jnp.float32) + bqkv_ref[...]   # (BS, 3D)
    q = qkv[:, :D_MODEL].astype(jnp.bfloat16)       # scale already folded in
    k = qkv[:, D_MODEL:2 * D_MODEL].astype(jnp.bfloat16)
    v = qkv[:, 2 * D_MODEL:].astype(jnp.bfloat16)

    neg_bias = bias_ref[...]                        # (BS, BS) block-diagonal mask

    # ---- per-head scores / softmax / context (batch folded via the mask) ----
    ctx_parts = []
    for h in range(NUM_HEADS):
        lo = h * HEAD_DIM
        qh = q[:, lo:lo + HEAD_DIM]                 # (BS, hd)
        kh = k[:, lo:lo + HEAD_DIM]
        vh = v[:, lo:lo + HEAD_DIM]
        s = jnp.einsum('qd,kd->qk', qh, kh,
                       preferred_element_type=jnp.float32) + neg_bias   # (BS, BS)
        s = s - jnp.max(s, axis=-1, keepdims=True)
        p = jnp.exp(s)
        p = p * pl.reciprocal(jnp.sum(p, axis=-1, keepdims=True), approx=True)
        ctx_parts.append(jnp.dot(p.astype(jnp.bfloat16), vh,
                                 preferred_element_type=jnp.float32))   # (BS, hd)
    ctx = jnp.concatenate(ctx_parts, axis=-1)       # (BS, D) f32, head-major lanes

    # ---- dense output projection (single 128-deep contraction) ----
    attn = jnp.dot(ctx.astype(jnp.bfloat16), wo_ref[...],
                   preferred_element_type=jnp.float32) + bo_ref[...]    # (BS, D)

    # dropout1: identity (inference mode)

    # ---- add & layer-norm 1 (f32) ----
    y = attn + x
    mean = jnp.mean(y, axis=-1, keepdims=True)
    var = jnp.mean(jnp.square(y - mean), axis=-1, keepdims=True)
    y = (y - mean) * jax.lax.rsqrt(var + EPS) * g1_ref[...] + be1_ref[...]

    # ---- position-wise FFN: relu(y@W1+b1)@W2+b2 (bf16 MXU, f32 acc) ----
    h1 = jnp.dot(y.astype(jnp.bfloat16), w1_ref[...],
                 preferred_element_type=jnp.float32) + b1_ref[...]      # (BS, F)
    h1 = jnp.maximum(h1, 0.0)
    f = jnp.dot(h1.astype(jnp.bfloat16), w2_ref[...],
                preferred_element_type=jnp.float32) + b2_ref[...]       # (BS, D)

    # dropout2: identity (inference mode)

    # ---- add & layer-norm 2 (f32) ----
    z = f + y
    mean2 = jnp.mean(z, axis=-1, keepdims=True)
    var2 = jnp.mean(jnp.square(z - mean2), axis=-1, keepdims=True)
    z = (z - mean2) * jax.lax.rsqrt(var2 + EPS) * g2_ref[...] + be2_ref[...]

    o_ref[...] = z.astype(o_ref.dtype)


@jax.jit
def encoder_layer(x, params):
    B, S, D = x.shape
    F = params["w1"].shape[1]
    scale = 1.0 / math.sqrt(HEAD_DIM)

    # Weight layout: wqkv columns are [ all-Q | all-K | all-V ], head-major inside
    # each D-wide block.  (Importing PyTorch's per-head-interleaved qkv_layer
    # weights would require a column permutation first.)
    wqkv = params["wqkv"]
    bqkv = params["bqkv"]
    # fold softmax 1/sqrt(hd) into the Q projection columns
    wqkv = jnp.concatenate([wqkv[:, :D] * scale, wqkv[:, D:]], axis=1)
    bqkv = jnp.concatenate([bqkv[:D] * scale, bqkv[D:]])

    weights = (
        wqkv.astype(jnp.bfloat16),                                   # (D, 3D)
        bqkv.reshape(1, 3 * D).astype(jnp.float32),                  # (1, 3D)
        params["wo"].astype(jnp.bfloat16),                           # (D, D)
        params["bo"].reshape(1, D).astype(jnp.float32),              # (1, D)
        params["gamma1"].reshape(1, D).astype(jnp.float32),
        params["beta1"].reshape(1, D).astype(jnp.float32),
        params["w1"].astype(jnp.bfloat16),                           # (D, F)
        params["b1"].reshape(1, F).astype(jnp.float32),
        params["w2"].astype(jnp.bfloat16),                           # (F, D)
        params["b2"].reshape(1, D).astype(jnp.float32),
        params["gamma2"].reshape(1, D).astype(jnp.float32),
        params["beta2"].reshape(1, D).astype(jnp.float32),
    )

    # block-diagonal attention bias so the batch dim rides inside one score tile
    bid = jnp.arange(B * S, dtype=jnp.int32) // S
    attn_bias = jnp.where(bid[:, None] == bid[None, :],
                          jnp.float32(0.0), jnp.float32(-1e9))        # (BS, BS)

    x2 = x.reshape(B * S, D)
    act_spec = pl.BlockSpec((B * S, D), lambda i: (0, 0))
    full2d = lambda a: pl.BlockSpec(a.shape, lambda i: (0, 0))

    out = pl.pallas_call(
        encoder_layer_kernel,
        out_shape=jax.ShapeDtypeStruct((B * S, D), x.dtype),
        grid=(1,),
        in_specs=[act_spec, full2d(attn_bias)] + [full2d(w) for w in weights],
        out_specs=act_spec,
        compiler_params=pltpu.CompilerParams(
            dimension_semantics=("arbitrary",)),
    )(x2, attn_bias, *weights)
    return out.reshape(B, S, D)


# ------------------------------------------------------------------------------
# Pure-JAX reference (same math, same weight layout) for a correctness check.
# ------------------------------------------------------------------------------
def encoder_layer_ref(x, params):
    D, H, hd = D_MODEL, NUM_HEADS, HEAD_DIM
    B, S, _ = x.shape
    qkv = x @ params["wqkv"] + params["bqkv"]
    q, k, v = qkv[..., :D], qkv[..., D:2 * D], qkv[..., 2 * D:]

    def split(a):  # (B,S,D) -> (B,H,S,hd), head-major along D
        return a.reshape(B, S, H, hd).transpose(0, 2, 1, 3)

    q, k, v = split(q), split(k), split(v)
    s = jnp.einsum('bhqd,bhkd->bhqk', q, k) / math.sqrt(hd)
    p = jax.nn.softmax(s, axis=-1)
    ctx = jnp.einsum('bhqk,bhkd->bhqd', p, v)
    ctx = ctx.transpose(0, 2, 1, 3).reshape(B, S, D)
    attn = ctx @ params["wo"] + params["bo"]

    def ln(a, g, b):
        m = a.mean(-1, keepdims=True)
        var = ((a - m) ** 2).mean(-1, keepdims=True)
        return g * (a - m) / jnp.sqrt(var + EPS) + b

    y = ln(attn + x, params["gamma1"], params["beta1"])
    f = jnp.maximum(y @ params["w1"] + params["b1"], 0.0) @ params["w2"] + params["b2"]
    return ln(f + y, params["gamma2"], params["beta2"])


def init_params(key):
    ks = jax.random.split(key, 8)
    s = 0.02
    D, F = D_MODEL, FFN_HIDDEN
    return {
        "wqkv": s * jax.random.normal(ks[0], (D, 3 * D), jnp.float32),
        "bqkv": s * jax.random.normal(ks[1], (3 * D,), jnp.float32),
        "wo": s * jax.random.normal(ks[2], (D, D), jnp.float32),
        "bo": s * jax.random.normal(ks[3], (D,), jnp.float32),
        "gamma1": jnp.ones((D,), jnp.float32),
        "beta1": jnp.zeros((D,), jnp.float32),
        "w1": s * jax.random.normal(ks[4], (D, F), jnp.float32),
        "b1": s * jax.random.normal(ks[5], (F,), jnp.float32),
        "w2": s * jax.random.normal(ks[6], (F, D), jnp.float32),
        "b2": s * jax.random.normal(ks[7], (D,), jnp.float32),
        "gamma2": jnp.ones((D,), jnp.float32),
        "beta2": jnp.zeros((D,), jnp.float32),
    }


if __name__ == "__main__":
    key = jax.random.PRNGKey(0)
    k_x, k_p = jax.random.split(key)
    x = jax.random.normal(k_x, (BATCH, SEQ, D_MODEL), jnp.float32)
    params = init_params(k_p)

    out = encoder_layer(x, params)
    out = jax.block_until_ready(out)

    assert out.shape == (BATCH, SEQ, D_MODEL)
    assert jnp.all(jnp.isfinite(out))

    ref = encoder_layer_ref(x, params)
    max_err = float(jnp.max(jnp.abs(out - ref)))
    assert max_err < 5e-2, f"mismatch vs reference: {max_err}"

    print("KERNEL_OK")
</pallas_src>

<mosaic_0001>
module attributes {stable_mosaic.version = 11 : i64} {
  func.func @encoder_layer_kernel(%arg0: i32, %arg1: memref<16x128xf32, #tpu.memory_space<vmem>>, %arg2: memref<16x16xf32, #tpu.memory_space<vmem>>, %arg3: memref<128x384xbf16, #tpu.memory_space<vmem>>, %arg4: memref<1x384xf32, #tpu.memory_space<vmem>>, %arg5: memref<128x128xbf16, #tpu.memory_space<vmem>>, %arg6: memref<1x128xf32, #tpu.memory_space<vmem>>, %arg7: memref<1x128xf32, #tpu.memory_space<vmem>>, %arg8: memref<1x128xf32, #tpu.memory_space<vmem>>, %arg9: memref<128x256xbf16, #tpu.memory_space<vmem>>, %arg10: memref<1x256xf32, #tpu.memory_space<vmem>>, %arg11: memref<256x128xbf16, #tpu.memory_space<vmem>>, %arg12: memref<1x128xf32, #tpu.memory_space<vmem>>, %arg13: memref<1x128xf32, #tpu.memory_space<vmem>>, %arg14: memref<1x128xf32, #tpu.memory_space<vmem>>, %arg15: memref<16x128xf32, #tpu.memory_space<vmem>>) attributes {dimension_semantics = [#tpu.dimension_semantics<arbitrary>], iteration_bounds = array<i64: 1>, scalar_prefetch = 0 : i64, scratch_operands = 0 : i64, tpu.core_type = #tpu.core_type<tc>, window_params = [{pipeline_mode = #tpu.pipeline_mode<synchronous>, transform_indices = @transform_0, window_bounds = array<i64: 16, 128>}, {pipeline_mode = #tpu.pipeline_mode<synchronous>, transform_indices = @transform_1, window_bounds = array<i64: 16, 16>}, {pipeline_mode = #tpu.pipeline_mode<synchronous>, transform_indices = @transform_2, window_bounds = array<i64: 128, 384>}, {pipeline_mode = #tpu.pipeline_mode<synchronous>, transform_indices = @transform_3, window_bounds = array<i64: 1, 384>}, {pipeline_mode = #tpu.pipeline_mode<synchronous>, transform_indices = @transform_4, window_bounds = array<i64: 128, 128>}, {pipeline_mode = #tpu.pipeline_mode<synchronous>, transform_indices = @transform_5, window_bounds = array<i64: 1, 128>}, {pipeline_mode = #tpu.pipeline_mode<synchronous>, transform_indices = @transform_6, window_bounds = array<i64: 1, 128>}, {pipeline_mode = #tpu.pipeline_mode<synchronous>, transform_indices = @transform_7, window_bounds = array<i64: 1, 128>}, {pipeline_mode = #tpu.pipeline_mode<synchronous>, transform_indices = @transform_8, window_bounds = array<i64: 128, 256>}, {pipeline_mode = #tpu.pipeline_mode<synchronous>, transform_indices = @transform_9, window_bounds = array<i64: 1, 256>}, {pipeline_mode = #tpu.pipeline_mode<synchronous>, transform_indices = @transform_10, window_bounds = array<i64: 256, 128>}, {pipeline_mode = #tpu.pipeline_mode<synchronous>, transform_indices = @transform_11, window_bounds = array<i64: 1, 128>}, {pipeline_mode = #tpu.pipeline_mode<synchronous>, transform_indices = @transform_12, window_bounds = array<i64: 1, 128>}, {pipeline_mode = #tpu.pipeline_mode<synchronous>, transform_indices = @transform_13, window_bounds = array<i64: 1, 128>}, {pipeline_mode = #tpu.pipeline_mode<synchronous>, transform_indices = @transform_14, window_bounds = array<i64: 16, 128>}]} {
    %c0 = arith.constant 0 : index
    %c0_0 = arith.constant 0 : index
    %0 = vector.load %arg1[%c0, %c0_0] : memref<16x128xf32, #tpu.memory_space<vmem>>, vector<16x128xf32>
    %1 = arith.truncf %0 : vector<16x128xf32> to vector<16x128xbf16>
    %c0_1 = arith.constant 0 : index
    %c0_2 = arith.constant 0 : index
    %2 = vector.load %arg3[%c0_1, %c0_2] : memref<128x384xbf16, #tpu.memory_space<vmem>>, vector<128x384xbf16>
    %cst = arith.constant dense<0.000000e+00> : vector<16x384xf32>
    %3 = tpu.matmul %1, %2, %cst {dimension_numbers = #tpu.dot_dimension_numbers<[1], [0], [0], [1], [0, 0, 1, 1], [], []>} : vector<16x128xbf16>, vector<128x384xbf16>, vector<16x384xf32> -> vector<16x384xf32>
    %c0_3 = arith.constant 0 : index
    %c0_4 = arith.constant 0 : index
    %4 = vector.load %arg4[%c0_3, %c0_4] : memref<1x384xf32, #tpu.memory_space<vmem>>, vector<1x384xf32>
    %5 = vector.broadcast %4 : vector<1x384xf32> to vector<16x384xf32>
    %6 = arith.addf %3, %5 : vector<16x384xf32>
    %7 = vector.extract_strided_slice %6 {offsets = [0, 0], sizes = [16, 128], strides = [1, 1]} : vector<16x384xf32> to vector<16x128xf32>
    %8 = arith.truncf %7 : vector<16x128xf32> to vector<16x128xbf16>
    %9 = vector.extract_strided_slice %6 {offsets = [0, 128], sizes = [16, 128], strides = [1, 1]} : vector<16x384xf32> to vector<16x128xf32>
    %10 = arith.truncf %9 : vector<16x128xf32> to vector<16x128xbf16>
    %11 = vector.extract_strided_slice %6 {offsets = [0, 256], sizes = [16, 128], strides = [1, 1]} : vector<16x384xf32> to vector<16x128xf32>
    %12 = arith.truncf %11 : vector<16x128xf32> to vector<16x128xbf16>
    %c0_5 = arith.constant 0 : index
    %c0_6 = arith.constant 0 : index
    %13 = vector.load %arg2[%c0_5, %c0_6] : memref<16x16xf32, #tpu.memory_space<vmem>>, vector<16x16xf32>
    %14 = vector.extract_strided_slice %8 {offsets = [0, 0], sizes = [16, 16], strides = [1, 1]} : vector<16x128xbf16> to vector<16x16xbf16>
    %15 = vector.extract_strided_slice %10 {offsets = [0, 0], sizes = [16, 16], strides = [1, 1]} : vector<16x128xbf16> to vector<16x16xbf16>
    %16 = vector.extract_strided_slice %12 {offsets = [0, 0], sizes = [16, 16], strides = [1, 1]} : vector<16x128xbf16> to vector<16x16xbf16>
    "tpu.trace_start"() <{level = 10 : i32, message = "qd,kd->qk"}> : () -> ()
    %cst_7 = arith.constant dense<0.000000e+00> : vector<16x16xf32>
    %17 = tpu.matmul %14, %15, %cst_7 {dimension_numbers = #tpu.dot_dimension_numbers<[1], [1], [0], [0], [0, 0, 1, 0], [], []>} : vector<16x16xbf16>, vector<16x16xbf16>, vector<16x16xf32> -> vector<16x16xf32>
    "tpu.trace_stop"() : () -> ()
    %18 = arith.addf %17, %13 : vector<16x16xf32>
    %cst_8 = arith.constant dense<0xFF800000> : vector<16xf32>
    %19 = vector.multi_reduction <maximumf>, %18, %cst_8 [1] : vector<16x16xf32> to vector<16xf32>
    %20 = vector.shape_cast %19 : vector<16xf32> to vector<16x1xf32>
    %21 = vector.broadcast %20 : vector<16x1xf32> to vector<16x16xf32>
    %22 = arith.subf %18, %21 : vector<16x16xf32>
    %23 = math.exp %22 : vector<16x16xf32>
    %cst_9 = arith.constant dense<0.000000e+00> : vector<16xf32>
    %24 = vector.multi_reduction <add>, %23, %cst_9 [1] : vector<16x16xf32> to vector<16xf32>
    %25 = vector.shape_cast %24 : vector<16xf32> to vector<16x1xf32>
    %26 = tpu.reciprocal %25 {approx = true} : vector<16x1xf32> -> vector<16x1xf32>
    %27 = vector.broadcast %26 : vector<16x1xf32> to vector<16x16xf32>
    %28 = arith.mulf %23, %27 : vector<16x16xf32>
    %29 = arith.truncf %28 : vector<16x16xf32> to vector<16x16xbf16>
    %cst_10 = arith.constant dense<0.000000e+00> : vector<16x16xf32>
    %30 = tpu.matmul %29, %16, %cst_10 {dimension_numbers = #tpu.dot_dimension_numbers<[1], [0], [0], [1], [0, 0, 1, 1], [], []>} : vector<16x16xbf16>, vector<16x16xbf16>, vector<16x16xf32> -> vector<16x16xf32>
    %31 = vector.extract_strided_slice %8 {offsets = [0, 16], sizes = [16, 16], strides = [1, 1]} : vector<16x128xbf16> to vector<16x16xbf16>
    %32 = vector.extract_strided_slice %10 {offsets = [0, 16], sizes = [16, 16], strides = [1, 1]} : vector<16x128xbf16> to vector<16x16xbf16>
    %33 = vector.extract_strided_slice %12 {offsets = [0, 16], sizes = [16, 16], strides = [1, 1]} : vector<16x128xbf16> to vector<16x16xbf16>
    "tpu.trace_start"() <{level = 10 : i32, message = "qd,kd->qk"}> : () -> ()
    %cst_11 = arith.constant dense<0.000000e+00> : vector<16x16xf32>
    %34 = tpu.matmul %31, %32, %cst_11 {dimension_numbers = #tpu.dot_dimension_numbers<[1], [1], [0], [0], [0, 0, 1, 0], [], []>} : vector<16x16xbf16>, vector<16x16xbf16>, vector<16x16xf32> -> vector<16x16xf32>
    "tpu.trace_stop"() : () -> ()
    %35 = arith.addf %34, %13 : vector<16x16xf32>
    %cst_12 = arith.constant dense<0xFF800000> : vector<16xf32>
    %36 = vector.multi_reduction <maximumf>, %35, %cst_12 [1] : vector<16x16xf32> to vector<16xf32>
    %37 = vector.shape_cast %36 : vector<16xf32> to vector<16x1xf32>
    %38 = vector.broadcast %37 : vector<16x1xf32> to vector<16x16xf32>
    %39 = arith.subf %35, %38 : vector<16x16xf32>
    %40 = math.exp %39 : vector<16x16xf32>
    %cst_13 = arith.constant dense<0.000000e+00> : vector<16xf32>
    %41 = vector.multi_reduction <add>, %40, %cst_13 [1] : vector<16x16xf32> to vector<16xf32>
    %42 = vector.shape_cast %41 : vector<16xf32> to vector<16x1xf32>
    %43 = tpu.reciprocal %42 {approx = true} : vector<16x1xf32> -> vector<16x1xf32>
    %44 = vector.broadcast %43 : vector<16x1xf32> to vector<16x16xf32>
    %45 = arith.mulf %40, %44 : vector<16x16xf32>
    %46 = arith.truncf %45 : vector<16x16xf32> to vector<16x16xbf16>
    %cst_14 = arith.constant dense<0.000000e+00> : vector<16x16xf32>
    %47 = tpu.matmul %46, %33, %cst_14 {dimension_numbers = #tpu.dot_dimension_numbers<[1], [0], [0], [1], [0, 0, 1, 1], [], []>} : vector<16x16xbf16>, vector<16x16xbf16>, vector<16x16xf32> -> vector<16x16xf32>
    %48 = vector.extract_strided_slice %8 {offsets = [0, 32], sizes = [16, 16], strides = [1, 1]} : vector<16x128xbf16> to vector<16x16xbf16>
    %49 = vector.extract_strided_slice %10 {offsets = [0, 32], sizes = [16, 16], strides = [1, 1]} : vector<16x128xbf16> to vector<16x16xbf16>
    %50 = vector.extract_strided_slice %12 {offsets = [0, 32], sizes = [16, 16], strides = [1, 1]} : vector<16x128xbf16> to vector<16x16xbf16>
    "tpu.trace_start"() <{level = 10 : i32, message = "qd,kd->qk"}> : () -> ()
    %cst_15 = arith.constant dense<0.000000e+00> : vector<16x16xf32>
    %51 = tpu.matmul %48, %49, %cst_15 {dimension_numbers = #tpu.dot_dimension_numbers<[1], [1], [0], [0], [0, 0, 1, 0], [], []>} : vector<16x16xbf16>, vector<16x16xbf16>, vector<16x16xf32> -> vector<16x16xf32>
    "tpu.trace_stop"() : () -> ()
    %52 = arith.addf %51, %13 : vector<16x16xf32>
    %cst_16 = arith.constant dense<0xFF800000> : vector<16xf32>
    %53 = vector.multi_reduction <maximumf>, %52, %cst_16 [1] : vector<16x16xf32> to vector<16xf32>
    %54 = vector.shape_cast %53 : vector<16xf32> to vector<16x1xf32>
    %55 = vector.broadcast %54 : vector<16x1xf32> to vector<16x16xf32>
    %56 = arith.subf %52, %55 : vector<16x16xf32>
    %57 = math.exp %56 : vector<16x16xf32>
    %cst_17 = arith.constant dense<0.000000e+00> : vector<16xf32>
    %58 = vector.multi_reduction <add>, %57, %cst_17 [1] : vector<16x16xf32> to vector<16xf32>
    %59 = vector.shape_cast %58 : vector<16xf32> to vector<16x1xf32>
    %60 = tpu.reciprocal %59 {approx = true} : vector<16x1xf32> -> vector<16x1xf32>
    %61 = vector.broadcast %60 : vector<16x1xf32> to vector<16x16xf32>
    %62 = arith.mulf %57, %61 : vector<16x16xf32>
    %63 = arith.truncf %62 : vector<16x16xf32> to vector<16x16xbf16>
    %cst_18 = arith.constant dense<0.000000e+00> : vector<16x16xf32>
    %64 = tpu.matmul %63, %50, %cst_18 {dimension_numbers = #tpu.dot_dimension_numbers<[1], [0], [0], [1], [0, 0, 1, 1], [], []>} : vector<16x16xbf16>, vector<16x16xbf16>, vector<16x16xf32> -> vector<16x16xf32>
    %65 = vector.extract_strided_slice %8 {offsets = [0, 48], sizes = [16, 16], strides = [1, 1]} : vector<16x128xbf16> to vector<16x16xbf16>
    %66 = vector.extract_strided_slice %10 {offsets = [0, 48], sizes = [16, 16], strides = [1, 1]} : vector<16x128xbf16> to vector<16x16xbf16>
    %67 = vector.extract_strided_slice %12 {offsets = [0, 48], sizes = [16, 16], strides = [1, 1]} : vector<16x128xbf16> to vector<16x16xbf16>
    "tpu.trace_start"() <{level = 10 : i32, message = "qd,kd->qk"}> : () -> ()
    %cst_19 = arith.constant dense<0.000000e+00> : vector<16x16xf32>
    %68 = tpu.matmul %65, %66, %cst_19 {dimension_numbers = #tpu.dot_dimension_numbers<[1], [1], [0], [0], [0, 0, 1, 0], [], []>} : vector<16x16xbf16>, vector<16x16xbf16>, vector<16x16xf32> -> vector<16x16xf32>
    "tpu.trace_stop"() : () -> ()
    %69 = arith.addf %68, %13 : vector<16x16xf32>
    %cst_20 = arith.constant dense<0xFF800000> : vector<16xf32>
    %70 = vector.multi_reduction <maximumf>, %69, %cst_20 [1] : vector<16x16xf32> to vector<16xf32>
    %71 = vector.shape_cast %70 : vector<16xf32> to vector<16x1xf32>
    %72 = vector.broadcast %71 : vector<16x1xf32> to vector<16x16xf32>
    %73 = arith.subf %69, %72 : vector<16x16xf32>
    %74 = math.exp %73 : vector<16x16xf32>
    %cst_21 = arith.constant dense<0.000000e+00> : vector<16xf32>
    %75 = vector.multi_reduction <add>, %74, %cst_21 [1] : vector<16x16xf32> to vector<16xf32>
    %76 = vector.shape_cast %75 : vector<16xf32> to vector<16x1xf32>
    %77 = tpu.reciprocal %76 {approx = true} : vector<16x1xf32> -> vector<16x1xf32>
    %78 = vector.broadcast %77 : vector<16x1xf32> to vector<16x16xf32>
    %79 = arith.mulf %74, %78 : vector<16x16xf32>
    %80 = arith.truncf %79 : vector<16x16xf32> to vector<16x16xbf16>
    %cst_22 = arith.constant dense<0.000000e+00> : vector<16x16xf32>
    %81 = tpu.matmul %80, %67, %cst_22 {dimension_numbers = #tpu.dot_dimension_numbers<[1], [0], [0], [1], [0, 0, 1, 1], [], []>} : vector<16x16xbf16>, vector<16x16xbf16>, vector<16x16xf32> -> vector<16x16xf32>
    %82 = vector.extract_strided_slice %8 {offsets = [0, 64], sizes = [16, 16], strides = [1, 1]} : vector<16x128xbf16> to vector<16x16xbf16>
    %83 = vector.extract_strided_slice %10 {offsets = [0, 64], sizes = [16, 16], strides = [1, 1]} : vector<16x128xbf16> to vector<16x16xbf16>
    %84 = vector.extract_strided_slice %12 {offsets = [0, 64], sizes = [16, 16], strides = [1, 1]} : vector<16x128xbf16> to vector<16x16xbf16>
    "tpu.trace_start"() <{level = 10 : i32, message = "qd,kd->qk"}> : () -> ()
    %cst_23 = arith.constant dense<0.000000e+00> : vector<16x16xf32>
    %85 = tpu.matmul %82, %83, %cst_23 {dimension_numbers = #tpu.dot_dimension_numbers<[1], [1], [0], [0], [0, 0, 1, 0], [], []>} : vector<16x16xbf16>, vector<16x16xbf16>, vector<16x16xf32> -> vector<16x16xf32>
    "tpu.trace_stop"() : () -> ()
    %86 = arith.addf %85, %13 : vector<16x16xf32>
    %cst_24 = arith.constant dense<0xFF800000> : vector<16xf32>
    %87 = vector.multi_reduction <maximumf>, %86, %cst_24 [1] : vector<16x16xf32> to vector<16xf32>
    %88 = vector.shape_cast %87 : vector<16xf32> to vector<16x1xf32>
    %89 = vector.broadcast %88 : vector<16x1xf32> to vector<16x16xf32>
    %90 = arith.subf %86, %89 : vector<16x16xf32>
    %91 = math.exp %90 : vector<16x16xf32>
    %cst_25 = arith.constant dense<0.000000e+00> : vector<16xf32>
    %92 = vector.multi_reduction <add>, %91, %cst_25 [1] : vector<16x16xf32> to vector<16xf32>
    %93 = vector.shape_cast %92 : vector<16xf32> to vector<16x1xf32>
    %94 = tpu.reciprocal %93 {approx = true} : vector<16x1xf32> -> vector<16x1xf32>
    %95 = vector.broadcast %94 : vector<16x1xf32> to vector<16x16xf32>
    %96 = arith.mulf %91, %95 : vector<16x16xf32>
    %97 = arith.truncf %96 : vector<16x16xf32> to vector<16x16xbf16>
    %cst_26 = arith.constant dense<0.000000e+00> : vector<16x16xf32>
    %98 = tpu.matmul %97, %84, %cst_26 {dimension_numbers = #tpu.dot_dimension_numbers<[1], [0], [0], [1], [0, 0, 1, 1], [], []>} : vector<16x16xbf16>, vector<16x16xbf16>, vector<16x16xf32> -> vector<16x16xf32>
    %99 = vector.extract_strided_slice %8 {offsets = [0, 80], sizes = [16, 16], strides = [1, 1]} : vector<16x128xbf16> to vector<16x16xbf16>
    %100 = vector.extract_strided_slice %10 {offsets = [0, 80], sizes = [16, 16], strides = [1, 1]} : vector<16x128xbf16> to vector<16x16xbf16>
    %101 = vector.extract_strided_slice %12 {offsets = [0, 80], sizes = [16, 16], strides = [1, 1]} : vector<16x128xbf16> to vector<16x16xbf16>
    "tpu.trace_start"() <{level = 10 : i32, message = "qd,kd->qk"}> : () -> ()
    %cst_27 = arith.constant dense<0.000000e+00> : vector<16x16xf32>
    %102 = tpu.matmul %99, %100, %cst_27 {dimension_numbers = #tpu.dot_dimension_numbers<[1], [1], [0], [0], [0, 0, 1, 0], [], []>} : vector<16x16xbf16>, vector<16x16xbf16>, vector<16x16xf32> -> vector<16x16xf32>
    "tpu.trace_stop"() : () -> ()
    %103 = arith.addf %102, %13 : vector<16x16xf32>
    %cst_28 = arith.constant dense<0xFF800000> : vector<16xf32>
    %104 = vector.multi_reduction <maximumf>, %103, %cst_28 [1] : vector<16x16xf32> to vector<16xf32>
    %105 = vector.shape_cast %104 : vector<16xf32> to vector<16x1xf32>
    %106 = vector.broadcast %105 : vector<16x1xf32> to vector<16x16xf32>
    %107 = arith.subf %103, %106 : vector<16x16xf32>
    %108 = math.exp %107 : vector<16x16xf32>
    %cst_29 = arith.constant dense<0.000000e+00> : vector<16xf32>
    %109 = vector.multi_reduction <add>, %108, %cst_29 [1] : vector<16x16xf32> to vector<16xf32>
    %110 = vector.shape_cast %109 : vector<16xf32> to vector<16x1xf32>
    %111 = tpu.reciprocal %110 {approx = true} : vector<16x1xf32> -> vector<16x1xf32>
    %112 = vector.broadcast %111 : vector<16x1xf32> to vector<16x16xf32>
    %113 = arith.mulf %108, %112 : vector<16x16xf32>
    %114 = arith.truncf %113 : vector<16x16xf32> to vector<16x16xbf16>
    %cst_30 = arith.constant dense<0.000000e+00> : vector<16x16xf32>
    %115 = tpu.matmul %114, %101, %cst_30 {dimension_numbers = #tpu.dot_dimension_numbers<[1], [0], [0], [1], [0, 0, 1, 1], [], []>} : vector<16x16xbf16>, vector<16x16xbf16>, vector<16x16xf32> -> vector<16x16xf32>
    %116 = vector.extract_strided_slice %8 {offsets = [0, 96], sizes = [16, 16], strides = [1, 1]} : vector<16x128xbf16> to vector<16x16xbf16>
    %117 = vector.extract_strided_slice %10 {offsets = [0, 96], sizes = [16, 16], strides = [1, 1]} : vector<16x128xbf16> to vector<16x16xbf16>
    %118 = vector.extract_strided_slice %12 {offsets = [0, 96], sizes = [16, 16], strides = [1, 1]} : vector<16x128xbf16> to vector<16x16xbf16>
    "tpu.trace_start"() <{level = 10 : i32, message = "qd,kd->qk"}> : () -> ()
    %cst_31 = arith.constant dense<0.000000e+00> : vector<16x16xf32>
    %119 = tpu.matmul %116, %117, %cst_31 {dimension_numbers = #tpu.dot_dimension_numbers<[1], [1], [0], [0], [0, 0, 1, 0], [], []>} : vector<16x16xbf16>, vector<16x16xbf16>, vector<16x16xf32> -> vector<16x16xf32>
    "tpu.trace_stop"() : () -> ()
    %120 = arith.addf %119, %13 : vector<16x16xf32>
    %cst_32 = arith.constant dense<0xFF800000> : vector<16xf32>
    %121 = vector.multi_reduction <maximumf>, %120, %cst_32 [1] : vector<16x16xf32> to vector<16xf32>
    %122 = vector.shape_cast %121 : vector<16xf32> to vector<16x1xf32>
    %123 = vector.broadcast %122 : vector<16x1xf32> to vector<16x16xf32>
    %124 = arith.subf %120, %123 : vector<16x16xf32>
    %125 = math.exp %124 : vector<16x16xf32>
    %cst_33 = arith.constant dense<0.000000e+00> : vector<16xf32>
    %126 = vector.multi_reduction <add>, %125, %cst_33 [1] : vector<16x16xf32> to vector<16xf32>
    %127 = vector.shape_cast %126 : vector<16xf32> to vector<16x1xf32>
    %128 = tpu.reciprocal %127 {approx = true} : vector<16x1xf32> -> vector<16x1xf32>
    %129 = vector.broadcast %128 : vector<16x1xf32> to vector<16x16xf32>
    %130 = arith.mulf %125, %129 : vector<16x16xf32>
    %131 = arith.truncf %130 : vector<16x16xf32> to vector<16x16xbf16>
    %cst_34 = arith.constant dense<0.000000e+00> : vector<16x16xf32>
    %132 = tpu.matmul %131, %118, %cst_34 {dimension_numbers = #tpu.dot_dimension_numbers<[1], [0], [0], [1], [0, 0, 1, 1], [], []>} : vector<16x16xbf16>, vector<16x16xbf16>, vector<16x16xf32> -> vector<16x16xf32>
    %133 = vector.extract_strided_slice %8 {offsets = [0, 112], sizes = [16, 16], strides = [1, 1]} : vector<16x128xbf16> to vector<16x16xbf16>
    %134 = vector.extract_strided_slice %10 {offsets = [0, 112], sizes = [16, 16], strides = [1, 1]} : vector<16x128xbf16> to vector<16x16xbf16>
    %135 = vector.extract_strided_slice %12 {offsets = [0, 112], sizes = [16, 16], strides = [1, 1]} : vector<16x128xbf16> to vector<16x16xbf16>
    "tpu.trace_start"() <{level = 10 : i32, message = "qd,kd->qk"}> : () -> ()
    %cst_35 = arith.constant dense<0.000000e+00> : vector<16x16xf32>
    %136 = tpu.matmul %133, %134, %cst_35 {dimension_numbers = #tpu.dot_dimension_numbers<[1], [1], [0], [0], [0, 0, 1, 0], [], []>} : vector<16x16xbf16>, vector<16x16xbf16>, vector<16x16xf32> -> vector<16x16xf32>
    "tpu.trace_stop"() : () -> ()
    %137 = arith.addf %136, %13 : vector<16x16xf32>
    %cst_36 = arith.constant dense<0xFF800000> : vector<16xf32>
    %138 = vector.multi_reduction <maximumf>, %137, %cst_36 [1] : vector<16x16xf32> to vector<16xf32>
    %139 = vector.shape_cast %138 : vector<16xf32> to vector<16x1xf32>
    %140 = vector.broadcast %139 : vector<16x1xf32> to vector<16x16xf32>
    %141 = arith.subf %137, %140 : vector<16x16xf32>
    %142 = math.exp %141 : vector<16x16xf32>
    %cst_37 = arith.constant dense<0.000000e+00> : vector<16xf32>
    %143 = vector.multi_reduction <add>, %142, %cst_37 [1] : vector<16x16xf32> to vector<16xf32>
    %144 = vector.shape_cast %143 : vector<16xf32> to vector<16x1xf32>
    %145 = tpu.reciprocal %144 {approx = true} : vector<16x1xf32> -> vector<16x1xf32>
    %146 = vector.broadcast %145 : vector<16x1xf32> to vector<16x16xf32>
    %147 = arith.mulf %142, %146 : vector<16x16xf32>
    %148 = arith.truncf %147 : vector<16x16xf32> to vector<16x16xbf16>
    %cst_38 = arith.constant dense<0.000000e+00> : vector<16x16xf32>
    %149 = tpu.matmul %148, %135, %cst_38 {dimension_numbers = #tpu.dot_dimension_numbers<[1], [0], [0], [1], [0, 0, 1, 1], [], []>} : vector<16x16xbf16>, vector<16x16xbf16>, vector<16x16xf32> -> vector<16x16xf32>
    %150 = tpu.concatenate %30, %47, %64, %81, %98, %115, %132, %149 in 1 : vector<16x16xf32>, vector<16x16xf32>, vector<16x16xf32>, vector<16x16xf32>, vector<16x16xf32>, vector<16x16xf32>, vector<16x16xf32>, vector<16x16xf32> -> vector<16x128xf32>
    %151 = arith.truncf %150 : vector<16x128xf32> to vector<16x128xbf16>
    %c0_39 = arith.constant 0 : index
    %c0_40 = arith.constant 0 : index
    %152 = vector.load %arg5[%c0_39, %c0_40] : memref<128x128xbf16, #tpu.memory_space<vmem>>, vector<128x128xbf16>
    %cst_41 = arith.constant dense<0.000000e+00> : vector<16x128xf32>
    %153 = tpu.matmul %151, %152, %cst_41 {dimension_numbers = #tpu.dot_dimension_numbers<[1], [0], [0], [1], [0, 0, 1, 1], [], []>} : vector<16x128xbf16>, vector<128x128xbf16>, vector<16x128xf32> -> vector<16x128xf32>
    %c0_42 = arith.constant 0 : index
    %c0_43 = arith.constant 0 : index
    %154 = vector.load %arg6[%c0_42, %c0_43] : memref<1x128xf32, #tpu.memory_space<vmem>>, vector<1x128xf32>
    %155 = vector.broadcast %154 : vector<1x128xf32> to vector<16x128xf32>
    %156 = arith.addf %153, %155 : vector<16x128xf32>
    %157 = arith.addf %156, %0 : vector<16x128xf32>
    %cst_44 = arith.constant dense<0.000000e+00> : vector<16xf32>
    %158 = vector.multi_reduction <add>, %157, %cst_44 [1] : vector<16x128xf32> to vector<16xf32>
    %159 = vector.shape_cast %158 : vector<16xf32> to vector<16x1xf32>
    %cst_45 = arith.constant 1.280000e+02 : f32
    %160 = vector.broadcast %cst_45 : f32 to vector<16x1xf32>
    %161 = arith.divf %159, %160 : vector<16x1xf32>
    %162 = vector.broadcast %161 : vector<16x1xf32> to vector<16x128xf32>
    %163 = arith.subf %157, %162 : vector<16x128xf32>
    %164 = arith.mulf %163, %163 : vector<16x128xf32>
    %cst_46 = arith.constant dense<0.000000e+00> : vector<16xf32>
    %165 = vector.multi_reduction <add>, %164, %cst_46 [1] : vector<16x128xf32> to vector<16xf32>
    %166 = vector.shape_cast %165 : vector<16xf32> to vector<16x1xf32>
    %cst_47 = arith.constant 1.280000e+02 : f32
    %167 = vector.broadcast %cst_47 : f32 to vector<16x1xf32>
    %168 = arith.divf %166, %167 : vector<16x1xf32>
    %169 = vector.broadcast %161 : vector<16x1xf32> to vector<16x128xf32>
    %170 = arith.subf %157, %169 : vector<16x128xf32>
    %cst_48 = arith.constant 9.99999974E-6 : f32
    %171 = vector.broadcast %cst_48 : f32 to vector<16x1xf32>
    %172 = arith.addf %168, %171 : vector<16x1xf32>
    %173 = math.rsqrt %172 : vector<16x1xf32>
    %174 = vector.broadcast %173 : vector<16x1xf32> to vector<16x128xf32>
    %175 = arith.mulf %170, %174 : vector<16x128xf32>
    %c0_49 = arith.constant 0 : index
    %c0_50 = arith.constant 0 : index
    %176 = vector.load %arg7[%c0_49, %c0_50] : memref<1x128xf32, #tpu.memory_space<vmem>>, vector<1x128xf32>
    %177 = vector.broadcast %176 : vector<1x128xf32> to vector<16x128xf32>
    %178 = arith.mulf %175, %177 : vector<16x128xf32>
    %c0_51 = arith.constant 0 : index
    %c0_52 = arith.constant 0 : index
    %179 = vector.load %arg8[%c0_51, %c0_52] : memref<1x128xf32, #tpu.memory_space<vmem>>, vector<1x128xf32>
    %180 = vector.broadcast %179 : vector<1x128xf32> to vector<16x128xf32>
    %181 = arith.addf %178, %180 : vector<16x128xf32>
    %182 = arith.truncf %181 : vector<16x128xf32> to vector<16x128xbf16>
    %c0_53 = arith.constant 0 : index
    %c0_54 = arith.constant 0 : index
    %183 = vector.load %arg9[%c0_53, %c0_54] : memref<128x256xbf16, #tpu.memory_space<vmem>>, vector<128x256xbf16>
    %cst_55 = arith.constant dense<0.000000e+00> : vector<16x256xf32>
    %184 = tpu.matmul %182, %183, %cst_55 {dimension_numbers = #tpu.dot_dimension_numbers<[1], [0], [0], [1], [0, 0, 1, 1], [], []>} : vector<16x128xbf16>, vector<128x256xbf16>, vector<16x256xf32> -> vector<16x256xf32>
    %c0_56 = arith.constant 0 : index
    %c0_57 = arith.constant 0 : index
    %185 = vector.load %arg10[%c0_56, %c0_57] : memref<1x256xf32, #tpu.memory_space<vmem>>, vector<1x256xf32>
    %186 = vector.broadcast %185 : vector<1x256xf32> to vector<16x256xf32>
    %187 = arith.addf %184, %186 : vector<16x256xf32>
    %cst_58 = arith.constant 0.000000e+00 : f32
    %188 = vector.broadcast %cst_58 : f32 to vector<16x256xf32>
    %189 = arith.maximumf %187, %188 : vector<16x256xf32>
    %190 = arith.truncf %189 : vector<16x256xf32> to vector<16x256xbf16>
    %c0_59 = arith.constant 0 : index
    %c0_60 = arith.constant 0 : index
    %191 = vector.load %arg11[%c0_59, %c0_60] : memref<256x128xbf16, #tpu.memory_space<vmem>>, vector<256x128xbf16>
    %cst_61 = arith.constant dense<0.000000e+00> : vector<16x128xf32>
    %192 = tpu.matmul %190, %191, %cst_61 {dimension_numbers = #tpu.dot_dimension_numbers<[1], [0], [0], [1], [0, 0, 1, 1], [], []>} : vector<16x256xbf16>, vector<256x128xbf16>, vector<16x128xf32> -> vector<16x128xf32>
    %c0_62 = arith.constant 0 : index
    %c0_63 = arith.constant 0 : index
    %193 = vector.load %arg12[%c0_62, %c0_63] : memref<1x128xf32, #tpu.memory_space<vmem>>, vector<1x128xf32>
    %194 = vector.broadcast %193 : vector<1x128xf32> to vector<16x128xf32>
    %195 = arith.addf %192, %194 : vector<16x128xf32>
    %196 = arith.addf %195, %181 : vector<16x128xf32>
    %cst_64 = arith.constant dense<0.000000e+00> : vector<16xf32>
    %197 = vector.multi_reduction <add>, %196, %cst_64 [1] : vector<16x128xf32> to vector<16xf32>
    %198 = vector.shape_cast %197 : vector<16xf32> to vector<16x1xf32>
    %cst_65 = arith.constant 1.280000e+02 : f32
    %199 = vector.broadcast %cst_65 : f32 to vector<16x1xf32>
    %200 = arith.divf %198, %199 : vector<16x1xf32>
    %201 = vector.broadcast %200 : vector<16x1xf32> to vector<16x128xf32>
    %202 = arith.subf %196, %201 : vector<16x128xf32>
    %203 = arith.mulf %202, %202 : vector<16x128xf32>
    %cst_66 = arith.constant dense<0.000000e+00> : vector<16xf32>
    %204 = vector.multi_reduction <add>, %203, %cst_66 [1] : vector<16x128xf32> to vector<16xf32>
    %205 = vector.shape_cast %204 : vector<16xf32> to vector<16x1xf32>
    %cst_67 = arith.constant 1.280000e+02 : f32
    %206 = vector.broadcast %cst_67 : f32 to vector<16x1xf32>
    %207 = arith.divf %205, %206 : vector<16x1xf32>
    %208 = vector.broadcast %200 : vector<16x1xf32> to vector<16x128xf32>
    %209 = arith.subf %196, %208 : vector<16x128xf32>
    %cst_68 = arith.constant 9.99999974E-6 : f32
    %210 = vector.broadcast %cst_68 : f32 to vector<16x1xf32>
    %211 = arith.addf %207, %210 : vector<16x1xf32>
    %212 = math.rsqrt %211 : vector<16x1xf32>
    %213 = vector.broadcast %212 : vector<16x1xf32> to vector<16x128xf32>
    %214 = arith.mulf %209, %213 : vector<16x128xf32>
    %c0_69 = arith.constant 0 : index
    %c0_70 = arith.constant 0 : index
    %215 = vector.load %arg13[%c0_69, %c0_70] : memref<1x128xf32, #tpu.memory_space<vmem>>, vector<1x128xf32>
    %216 = vector.broadcast %215 : vector<1x128xf32> to vector<16x128xf32>
    %217 = arith.mulf %214, %216 : vector<16x128xf32>
    %c0_71 = arith.constant 0 : index
    %c0_72 = arith.constant 0 : index
    %218 = vector.load %arg14[%c0_71, %c0_72] : memref<1x128xf32, #tpu.memory_space<vmem>>, vector<1x128xf32>
    %219 = vector.broadcast %218 : vector<1x128xf32> to vector<16x128xf32>
    %220 = arith.addf %217, %219 : vector<16x128xf32>
    %c0_73 = arith.constant 0 : index
    %c0_74 = arith.constant 0 : index
    %221 = vector.load %arg15[%c0_73, %c0_74] : memref<16x128xf32, #tpu.memory_space<vmem>>, vector<16x128xf32>
    tpu.vector_store %arg15[%c0_73, %c0_74], %220 {strides = array<i32>} : memref<16x128xf32, #tpu.memory_space<vmem>>, vector<16x128xf32>,
    return
  }
  func.func @transform_0(%arg0: i32) -> (i32, i32) {
    %c0_i32 = arith.constant 0 : i32
    %c0_i32_0 = arith.constant 0 : i32
    %c0_i32_1 = arith.constant 0 : i32
    return %c0_i32, %c0_i32_0 : i32, i32
  }
  func.func @transform_1(%arg0: i32) -> (i32, i32) {
    %c0_i32 = arith.constant 0 : i32
    %c0_i32_0 = arith.constant 0 : i32
    %c0_i32_1 = arith.constant 0 : i32
    return %c0_i32, %c0_i32_0 : i32, i32
  }
  func.func @transform_2(%arg0: i32) -> (i32, i32) {
    %c0_i32 = arith.constant 0 : i32
    %c0_i32_0 = arith.constant 0 : i32
    %c0_i32_1 = arith.constant 0 : i32
    return %c0_i32, %c0_i32_0 : i32, i32
  }
  func.func @transform_3(%arg0: i32) -> (i32, i32) {
    %c0_i32 = arith.constant 0 : i32
    %c0_i32_0 = arith.constant 0 : i32
    %c0_i32_1 = arith.constant 0 : i32
    return %c0_i32, %c0_i32_0 : i32, i32
  }
  func.func @transform_4(%arg0: i32) -> (i32, i32) {
    %c0_i32 = arith.constant 0 : i32
    %c0_i32_0 = arith.constant 0 : i32
    %c0_i32_1 = arith.constant 0 : i32
    return %c0_i32, %c0_i32_0 : i32, i32
  }
  func.func @transform_5(%arg0: i32) -> (i32, i32) {
    %c0_i32 = arith.constant 0 : i32
    %c0_i32_0 = arith.constant 0 : i32
    %c0_i32_1 = arith.constant 0 : i32
    return %c0_i32, %c0_i32_0 : i32, i32
  }
  func.func @transform_6(%arg0: i32) -> (i32, i32) {
    %c0_i32 = arith.constant 0 : i32
    %c0_i32_0 = arith.constant 0 : i32
    %c0_i32_1 = arith.constant 0 : i32
    return %c0_i32, %c0_i32_0 : i32, i32
  }
  func.func @transform_7(%arg0: i32) -> (i32, i32) {
    %c0_i32 = arith.constant 0 : i32
    %c0_i32_0 = arith.constant 0 : i32
    %c0_i32_1 = arith.constant 0 : i32
    return %c0_i32, %c0_i32_0 : i32, i32
  }
  func.func @transform_8(%arg0: i32) -> (i32, i32) {
    %c0_i32 = arith.constant 0 : i32
    %c0_i32_0 = arith.constant 0 : i32
    %c0_i32_1 = arith.constant 0 : i32
    return %c0_i32, %c0_i32_0 : i32, i32
  }
  func.func @transform_9(%arg0: i32) -> (i32, i32) {
    %c0_i32 = arith.constant 0 : i32
    %c0_i32_0 = arith.constant 0 : i32
    %c0_i32_1 = arith.constant 0 : i32
    return %c0_i32, %c0_i32_0 : i32, i32
  }
  func.func @transform_10(%arg0: i32) -> (i32, i32) {
    %c0_i32 = arith.constant 0 : i32
    %c0_i32_0 = arith.constant 0 : i32
    %c0_i32_1 = arith.constant 0 : i32
    return %c0_i32, %c0_i32_0 : i32, i32
  }
  func.func @transform_11(%arg0: i32) -> (i32, i32) {
    %c0_i32 = arith.constant 0 : i32
    %c0_i32_0 = arith.constant 0 : i32
    %c0_i32_1 = arith.constant 0 : i32
    return %c0_i32, %c0_i32_0 : i32, i32
  }
  func.func @transform_12(%arg0: i32) -> (i32, i32) {
    %c0_i32 = arith.constant 0 : i32
    %c0_i32_0 = arith.constant 0 : i32
    %c0_i32_1 = arith.constant 0 : i32
    return %c0_i32, %c0_i32_0 : i32, i32
  }
  func.func @transform_13(%arg0: i32) -> (i32, i32) {
    %c0_i32 = arith.constant 0 : i32
    %c0_i32_0 = arith.constant 0 : i32
    %c0_i32_1 = arith.constant 0 : i32
    return %c0_i32, %c0_i32_0 : i32, i32
  }
  func.func @transform_14(%arg0: i32) -> (i32, i32) {
    %c0_i32 = arith.constant 0 : i32
    %c0_i32_0 = arith.constant 0 : i32
    %c0_i32_1 = arith.constant 0 : i32
    return %c0_i32, %c0_i32_0 : i32, i32
  }
}

</mosaic_0001>

<bundles_post_ra>
// kernel: encoder_layer.1
= control target key start
LH: loop header
LB: loop body
LE: loop exit
PB: predicated region body
PF: predicated region fallthrough
CT: control target
= control target key end

     0   :  { %v2429_v2 = vmov 0   ;;  %v2430_v3 = vmov 0.0   ;;  %s3093_s0 = inlined_call_operand.vmem [shape: f32[16,128], index: 0, kind: input, shape index: {}]   ;;  %s3094_s1 = inlined_call_operand.vmem [shape: f32[16,16], index: 1, kind: input, shape index: {}]   ;;  %s3095_s2 = inlined_call_operand.vmem [shape: bf16[128,384], index: 2, kind: input, shape index: {}]   ;;  %s3096_s3 = inlined_call_operand.vmem [shape: f32[1,384], index: 3, kind: input, shape index: {}]   ;;  %s3097_s4 = inlined_call_operand.vmem [shape: bf16[128,128], index: 4, kind: input, shape index: {}]   ;;  %s3098_s5 = inlined_call_operand.vmem [shape: f32[1,128], index: 5, kind: input, shape index: {}]   ;;  %s3099_s6 = inlined_call_operand.vmem [shape: f32[1,128], index: 6, kind: input, shape index: {}]   ;;  %s3100_s7 = inlined_call_operand.vmem [shape: f32[1,128], index: 7, kind: input, shape index: {}]   ;;  %s3101_s8 = inlined_call_operand.vmem [shape: bf16[128,256], index: 8, kind: input, shape index: {}]   ;;  %s3102_s9 = inlined_call_operand.vmem [shape: f32[1,256], index: 9, kind: input, shape index: {}]   ;;  %s3103_s10 = inlined_call_operand.vmem [shape: bf16[256,128], index: 10, kind: input, shape index: {}]   ;;  %s3104_s11 = inlined_call_operand.vmem [shape: f32[1,128], index: 11, kind: input, shape index: {}]   ;;  %s3105_s12 = inlined_call_operand.vmem [shape: f32[1,128], index: 12, kind: input, shape index: {}]   ;;  %s3106_s13 = inlined_call_operand.vmem [shape: f32[1,128], index: 13, kind: input, shape index: {}]   ;;  %s3107_s14 = inlined_call_operand.hbm [shape: f32[16,128], index: 14, kind: output, shape index: {}]  }
   0x1   :  { %v2251_v0 = vld [vmem:[%s3095_s2 + $0x4] ss:$12 sps:$4 sm:$0xff]   ;;  %v2253_v1 = vld [vmem:[%s3095_s2] ss:$12 sps:$4 sm:$0xff]   ;;  %261 = vmatprep.mubr.bf16.mxu0 %v2429_v2  ;;  %2067 = vmatprep.subr.bf16.mxu1 %v2430_v3  ;;  %v2254_v4 = vld [vmem:[%s3095_s2 + $0x1c] ss:$12 sps:$4 sm:$0xff]  }
   0x2   :  { %229 = vmatprep.subr.bf16.mxu0 %v2251_v0  ;;  %v2256_v5 = vld [vmem:[%s3095_s2 + $0x18] ss:$12 sps:$4 sm:$0xff]   ;;  %v2257_v6 = vld [vmem:[%s3095_s2 + $0x34] ss:$12 sps:$4 sm:$0xff]   ;;  %v2259_v7 = vld [vmem:[%s3095_s2 + $0x30] ss:$12 sps:$4 sm:$0xff]  }
   0x3   :  { %230 = vmatpush1.bf16.msra.mxu0 %v2253_v1  ;;  %v2260_v8 = vld [vmem:[%s3095_s2 + $0x4c] ss:$12 sps:$4 sm:$0xff]   ;;  %v2262_v9 = vld [vmem:[%s3095_s2 + $0x48] ss:$12 sps:$4 sm:$0xff]   ;;  %v2263_v10 = vld [vmem:[%s3095_s2 + $0x64] ss:$12 sps:$4 sm:$0xff]  }
   0x4   :  { %231 = vmatprep.subr.bf16.mxu0 %v2254_v4  ;;  %v2275_v11 = vld [vmem:[%s3095_s2 + $0x8] ss:$12 sps:$4 sm:$0xff]   ;;  %v2276_v12 = vld [vmem:[%s3095_s2 + $0x20] ss:$12 sps:$4 sm:$0xff]   ;;  %v2268_v15 = vld [vmem:[%s3095_s2 + $0x78] ss:$12 sps:$4 sm:$0xff]  }
   0x5   :  { %2068 = vmatpush3.bf16.msra.mxu1 %v2275_v11  ;;  %v2265_v13 = vld [vmem:[%s3095_s2 + $0x60] ss:$12 sps:$4 sm:$0xff]   ;;  %v2266_v14 = vld [vmem:[%s3095_s2 + $0x7c] ss:$12 sps:$4 sm:$0xff]   ;;  %v2277_v17 = vld [vmem:[%s3095_s2 + $0x38] ss:$12 sps:$4 sm:$0xff]  }
   0x6   :  { %2069 = vmatprep.subr.bf16.mxu1 %v2430_v3  ;;  %v2269_v16 = vld [vmem:[%s3095_s2 + $0x94] ss:$12 sps:$4 sm:$0xff]   ;;  %v2278_v18 = vld [vmem:[%s3095_s2 + $0x50] ss:$12 sps:$4 sm:$0xff]   ;;  %v2272_v20 = vld [vmem:[%s3095_s2 + $0xac] ss:$12 sps:$4 sm:$0xff]  }
   0x7   :  { %232 = vmatpush1.bf16.msra.mxu0 %v2256_v5  ;;  %v2271_v19 = vld [vmem:[%s3095_s2 + $0x90] ss:$12 sps:$4 sm:$0xff]   ;;  %v2279_v21 = vld [vmem:[%s3095_s2 + $0x68] ss:$12 sps:$4 sm:$0xff]   ;;  %v49_v23 = vld [vmem:[%s3093_s0] sm:$0xff] }
   0x8   :  { %233 = vmatprep.subr.bf16.mxu0 %v2257_v6  ;;  %v2274_v22 = vld [vmem:[%s3095_s2 + $0xa8] ss:$12 sps:$4 sm:$0xff]   ;;  %v2280_v25 = vld [vmem:[%s3095_s2 + $0x80] ss:$12 sps:$4 sm:$0xff]   ;;  %v2281_v27 = vld [vmem:[%s3095_s2 + $0x98] ss:$12 sps:$4 sm:$0xff]  }
   0x9   :  { %2070 = vmatpush3.bf16.msra.mxu1 %v2276_v12  ;;  %v50_v24 = vld [vmem:[%s3093_s0 + $0x8] sm:$0xff] }
   0xa   :  { %2071 = vmatprep.subr.bf16.mxu1 %v2430_v3  ;;  %v51_v26 = vpack.c.bf16 %v50_v24, %v49_v23 }
   0xb   :  { %234 = vmatpush1.bf16.msra.mxu0 %v2259_v7 }
   0xc   :  { %235 = vmatprep.subr.bf16.mxu0 %v2260_v8 }
   0xd   :  { %2072 = vmatpush3.bf16.msra.mxu1 %v2277_v17 }
   0xe   :  { %2073 = vmatprep.subr.bf16.mxu1 %v2430_v3 }
   0xf   :  { %236 = vmatpush1.bf16.msra.mxu0 %v2262_v9 }
  0x10   :  { %237 = vmatprep.subr.bf16.mxu0 %v2263_v10 }
  0x11   :  { %2074 = vmatpush3.bf16.msra.mxu1 %v2278_v18 }
  0x12   :  { %2075 = vmatprep.subr.bf16.mxu1 %v2430_v3 }
  0x13   :  { %238 = vmatpush1.bf16.msra.mxu0 %v2265_v13 }
  0x14   :  { %239 = vmatprep.subr.bf16.mxu0 %v2266_v14 }
  0x15   :  { %2076 = vmatpush3.bf16.msra.mxu1 %v2279_v21 }
  0x16   :  { %2077 = vmatprep.subr.bf16.mxu1 %v2430_v3 }
  0x17   :  { %240 = vmatpush1.bf16.msra.mxu0 %v2268_v15 }
  0x18   :  { %241 = vmatprep.subr.bf16.mxu0 %v2269_v16 }
  0x19   :  { %2078 = vmatpush3.bf16.msra.mxu1 %v2280_v25 }
  0x1a   :  { %2079 = vmatprep.subr.bf16.mxu1 %v2430_v3 }
  0x1b   :  { %242 = vmatpush1.bf16.msra.mxu0 %v2271_v19 }
  0x1c   :  { %243 = vmatprep.subr.bf16.mxu0 %v2272_v20 }
  0x1d   :  { %2080 = vmatpush3.bf16.msra.mxu1 %v2281_v27 }
  0x1e   :  { %2081 = vmatprep.subr.bf16.mxu1 %v2430_v3 }
  0x1f   :  { %244 = vmatpush1.bf16.msra.mxu0 %v2274_v22 }
  0x20   :  { %2111 = vmatprep.subr.bf16.mxu0 %v2430_v3 }
  0x22   :  { %262 = vmatmul.mubr.bf16.vlgmr.msra.gmra.mrb[0].mxu0 %v51_v26 }
  0x23   :  { %19 = vsyncpa [#allocation3], 0  ;;  %v2282_v28 = vld [vmem:[%s3095_s2 + $0xb0] ss:$12 sps:$4 sm:$0xff]   ;;  %vm2431_vm0 = vmmov 0   ;;  %v86_v29 = vlaneseq  ;;  %vm318_vm1 = vcmask 130048  }
  0x24   :  { %2082 = vmatpush3.bf16.msra.mxu1 %v2282_v28  ;;  %2083 = vmatprep.mubr.msk.bf16.mxu1 %vm2431_vm0, %v2430_v3  ;;  %v84_v32 = vld [vmem:[%s3096_s3] sm:$0x7]  ;;  %v2644_v58 = vld [vmem:[%s3094_s1 + $0x8] sm:$0xff]  ;;  %s2432_s21 = smov 112   ;;  %s2433_s22 = smov 80   ;;  %vm1341_vm2 = vcmask 261120  }
  0x25   :  { %2087 = vmatprep.subr.bf16.mxu1 %v2430_v3  ;;  %2113 = vmatprep.mubr.msk.bf16.mxu0 %vm2431_vm0, %v2430_v3  ;;  %v2612_v30 = vshrl.u32 %v86_v29, 7  ;;  %v2639_v56 = vld [vmem:[%s3094_s1] sm:$0xff]  ;;  %s2434_s1 = smov 64   ;;  %s2435_s23 = smov 48   ;;  %vm1344_vm3 = vcmask 392192   ;;  %vm1347_vm4 = vcmask 523264  }
  0x26   :  { %s2436_s24 = smov 32   ;;  %s2437_s25 = smov 16   ;;  %vm1350_vm5 = vcmask 654336   ;;  %vm1353_vm6 = vcmask 785408   ;;  %vm1356_vm7 = vcmask 916480  }
  0x27   :  { %2084 = vmatmul.mubr.bf16.vlgmr.msra.gmra.mrb[0].mxu1 %v51_v26  ;;  %v88_v31 = vsub.s32 0, %v2612_v30  ;;  %v92_v33 = vsub.s32 1, %v2612_v30  ;;  %v96_v47 = vsub.s32 2, %v2612_v30  ;;  %s2438_s26 = smov 96   ;;  %v1976_v30 = vld [vmem:[%s3104_s11] ss:$0 sm:$0xff] }
  0x28   :  { %2089 = vmatprep.mubr.msk.bf16.mxu1 %vm2431_vm0, %v2430_v3  ;;  %s2439_s15 = smov [#allocation2]  }
  0x29   :  { %v89_v34 = vrot.slane %v84_v32, %v88_v31  ;;  %v93_v36 = vrot.slane %v84_v32, %v92_v33  ;;  %v97_v48 = vrot.slane %v84_v32, %v96_v47  ;;  %s1898_s16 = sshll.u32 %s2439_s15, 4  ;;  %s1899_s16 = int_to_ptr.vmem [resolvable:$true] %s1898_s16 }
  0x2a   :  { %s2405_s2 = scalar_lea.vmem %s1899_s16, 256  ;;  %p2410_p1 = scmp.lt.s32.totalorder %s1899_s16, %s1899_s16 }
  0x2b   :  { %p2406_p0 = scmp.ne.s32.totalorder %s1899_s16, %s2405_s2  ;;  %p2411_p2 = scmp.lt.s32.totalorder %s2405_s2, %s2405_s2 }
  0x2d   :  { %p2412_p3 = por %p2411_p2, %p2410_p1 }
  0x2f   :  { %p2413_p4 = pnand %p2412_p3, %p2406_p0 }
  0xf5   :  { %v263_v35 = vpop.f32.mrb[0].mxu0 }
  0xf6   :  { %v265_v37 = vpop.f32.mrb[1].mxu0  ;;  %v264_v39 = vadd.f32 %v263_v35, %v89_v34 }
  0xf7   :  { %v267_v38 = vpop.f32.mrb[2].mxu0  ;;  %v266_v42 = vadd.f32 %v265_v37, %v93_v36 }
  0xf8   :  { %v268_v40 = vadd.f32 %v267_v38, %v89_v34  ;;  %v269_v41 = vpop.f32.mrb[3].mxu0 }
  0xf9   :  { %v270_v43 = vadd.f32 %v269_v41, %v93_v36 }
  0xfa   :  { %v2623_v44 = vpack.c.bf16 %v268_v40, %v264_v39  ;;  %v306_v49 = vpop.f32.mrb[0].mxu1 }
  0xfb   :  { %v314_v45 = vpack.c.bf16 %v270_v43, %v266_v42  ;;  %v307_v50 = vadd.f32 %v306_v49, %v97_v48  ;;  %v2085_v51 = vpop.f32.mrb[1].mxu1 }
  0xfc   :  { %v309_v52 = vpop.f32.mrb[2].mxu1 }
  0xfd   :  { %v323_v46 = vsel %vm318_vm1, %v314_v45, 0  ;;  %v310_v53 = vadd.f32 %v309_v52, %v97_v48  ;;  %v2086_v54 = vpop.f32.mrb[3].mxu1 }
  0xfe   :  { %2088 = vmatpush3.bf16.xpose.msra.mxu1 %v323_v46 }
  0xff   :  { %2093 = vmatprep.subr.bf16.mxu1 %v2430_v3  ;;  %v2632_v55 = vpack.c.bf16 %v310_v53, %v307_v50 }
 0x105   :  { %2090 = vmatmul.mubr.msk.bf16.vlgmr.msra.gmra.mrb[4].mxu1 %vm318_vm1, %v2623_v44 }
 0x106   :  { %2095 = vmatprep.mubr.msk.bf16.mxu1 %vm2431_vm0, %v2430_v3  ;;  %2094 = vmatpush3.bf16.msra.mxu1 %v2632_v55 }
 0x107   :  { %2099 = vmatprep.subr.bf16.mxu1 %v2430_v3 }
 0x1d8   :  { %v359_v57 = vpop.f32.mrb[4].mxu1 }
 0x1d9   :  { %v360_v59 = vadd.f32 %v359_v57, %v2639_v56  ;;  %v2091_v60 = vpop.f32.mrb[5].mxu1 }
 0x1da   :  { %v362_v61 = vpop.f32.mrb[6].mxu1 }
 0x1db   :  { %v363_v62 = vadd.f32 %v362_v61, %v2644_v58  ;;  %v2092_v63 = vpop.f32.mrb[7].mxu1  ;;  %v366_v0 = vsel %vm318_vm1, %v360_v59, -inf }
 0x1dc   :  { %367 = vmax.xlane.f32.xlu0 %v366_v0 }
 0x1dd   :  { %v369_v1 = vsel %vm318_vm1, %v363_v62, -inf }
 0x1e0   :  { %370 = vmax.xlane.f32.xlu0 %v369_v1 }
 0x1f6   :  { %437 = vrot.lane.b32.xlu0 %v314_v45, %s2432_s21 }
 0x1fa   :  { %680 = vrot.lane.b32.xlu0 %v314_v45, %s2433_s22 }
 0x1fe   :  { %801 = vrot.lane.b32.xlu0 %v314_v45, %s2434_s1 }
 0x202   :  { %922 = vrot.lane.b32.xlu0 %v314_v45, %s2435_s23 }
 0x206   :  { %1043 = vrot.lane.b32.xlu0 %v314_v45, %s2436_s24 }
 0x20a   :  { %1164 = vrot.lane.b32.xlu0 %v314_v45, %s2437_s25 }
 0x269   :  { %v368_v4 = vpop.xlane.xlu0 %367 }
 0x26a   :  { %v372_v5 = vsub.f32 %v360_v59, %v368_v4 }
 0x26c   :  { %v374_v6 = vmul.f32 1.442695, %v372_v5 }
 0x26d   :  { %v371_v7 = vpop.xlane.xlu0 %370 }
 0x26e   :  { %2331 = vpow2.f32 %v374_v6  ;;  %v373_v8 = vsub.f32 %v363_v62, %v371_v7 }
 0x270   :  { %v376_v9 = vmul.f32 1.442695, %v373_v8 }
 0x271   :  { %v438_v17 = vpop.permute.xlu0 %437 }
 0x272   :  { %2333 = vpow2.f32 %v376_v9  ;;  %v443_v26 = vsel %vm318_vm1, %v438_v17, 0 }
 0x275   :  { %v681_v24 = vpop.permute.xlu0 %680 }
 0x276   :  { %v686_v28 = vsel %vm318_vm1, %v681_v24, 0 }
 0x278   :  { %v2332_v10 = vpop.eup %2331 }
 0x279   :  { %v378_v11 = vsel %vm318_vm1, %v2332_v10, 0.0  ;;  %v802_v29 = vpop.permute.xlu0 %801 }
 0x27a   :  { %379 = vadd.xlane.f32.xlu1 %v378_v11  ;;  %v807_v34 = vsel %vm318_vm1, %v802_v29, 0 }
 0x27c   :  { %v2334_v12 = vpop.eup %2333 }
 0x27d   :  { %v381_v13 = vsel %vm318_vm1, %v2334_v12, 0.0  ;;  %v923_v35 = vpop.permute.xlu0 %922 }
 0x27e   :  { %382 = vadd.xlane.f32.xlu1 %v381_v13  ;;  %v928_v37 = vsel %vm318_vm1, %v923_v35, 0 }
 0x281   :  { %v1044_v38 = vpop.permute.xlu0 %1043 }
 0x282   :  { %v1049_v40 = vsel %vm318_vm1, %v1044_v38, 0 }
 0x285   :  { %v1165_v41 = vpop.permute.xlu0 %1164 }
 0x286   :  { %v1170_v43 = vsel %vm318_vm1, %v1165_v41, 0 }
 0x28f   :  { %434 = vrot.lane.b32.xlu1 %v2623_v44, %s2432_s21 }
 0x293   :  { %559 = vrot.lane.b32.xlu1 %v314_v45, %s2438_s26 }
 0x297   :  { %557 = vrot.lane.b32.xlu1 %v2623_v44, %s2438_s26 }
 0x29b   :  { %678 = vrot.lane.b32.xlu1 %v2623_v44, %s2433_s22 }
 0x29f   :  { %799 = vrot.lane.b32.xlu1 %v2623_v44, %s2434_s1 }
 0x2a3   :  { %920 = vrot.lane.b32.xlu1 %v2623_v44, %s2435_s23 }
 0x2a7   :  { %1041 = vrot.lane.b32.xlu1 %v2623_v44, %s2436_s24 }
 0x2ab   :  { %1162 = vrot.lane.b32.xlu1 %v2623_v44, %s2437_s25 }
 0x307   :  { %v380_v14 = vpop.xlane.xlu1 %379 }
 0x308   :  { %2335 = vrcp.f32 %v380_v14 }
 0x30b   :  { %v383_v15 = vpop.xlane.xlu1 %382 }
 0x30c   :  { %2337 = vrcp.f32 %v383_v15 }
 0x30f   :  { %v435_v16 = vpop.permute.xlu1 %434 }
 0x312   :  { %v2336_v19 = vpop.eup %2335 }
 0x313   :  { %v560_v18 = vpop.permute.xlu1 %559  ;;  %v386_v22 = vmul.f32 %v2336_v19, %v2332_v10 }
 0x314   :  { %v565_v20 = vsel %vm318_vm1, %v560_v18, 0 }
 0x315   :  { %2112 = vmatpush3.bf16.xpose.msra.mxu0 %v565_v20 }
 0x316   :  { %v2338_v21 = vpop.eup %2337  ;;  %2123 = vmatprep.subr.bf16.mxu0 %v2430_v3 }
 0x317   :  { %v387_v23 = vmul.f32 %v2338_v21, %v2334_v12  ;;  %v558_v27 = vpop.permute.xlu1 %557 }
 0x319   :  { %v388_v25 = vpack.c.bf16 %v387_v23, %v386_v22 }
 0x31b   :  { %2096 = vmatmul.mubr.msk.bf16.vlgmr.msra.gmra.mrb[8].mxu1 %vm318_vm1, %v388_v25  ;;  %v679_v32 = vpop.permute.xlu1 %678 }
 0x31c   :  { %2100 = vmatpush3.bf16.xpose.msra.mxu1 %v443_v26  ;;  %2114 = vmatmul.mubr.msk.bf16.vlgmr.msra.gmra.mrb[4].mxu0 %vm318_vm1, %v558_v27 }
 0x31d   :  { %2124 = vmatpush3.bf16.xpose.msra.mxu0 %v686_v28  ;;  %2101 = vmatprep.mubr.msk.bf16.mxu1 %vm2431_vm0, %v2430_v3 }
 0x31e   :  { %2125 = vmatprep.mubr.msk.bf16.mxu0 %vm2431_vm0, %v2430_v3  ;;  %2135 = vmatprep.subr.bf16.mxu0 %v2430_v3 }
 0x31f   :  { %2105 = vmatprep.subr.bf16.mxu1 %v2430_v3  ;;  %v800_v36 = vpop.permute.xlu1 %799 }
 0x323   :  { %2102 = vmatmul.mubr.msk.bf16.vlgmr.msra.gmra.mrb[12].mxu1 %vm318_vm1, %v435_v16  ;;  %v921_v39 = vpop.permute.xlu1 %920 }
 0x324   :  { %2126 = vmatmul.mubr.msk.bf16.vlgmr.msra.gmra.mrb[8].mxu0 %vm318_vm1, %v679_v32  ;;  %2107 = vmatprep.mubr.msk.bf16.mxu1 %vm2431_vm0, %v2430_v3 }
 0x325   :  { %2136 = vmatpush3.bf16.xpose.msra.mxu0 %v807_v34  ;;  %2137 = vmatprep.mubr.msk.bf16.mxu0 %vm2431_vm0, %v2430_v3 }
 0x326   :  { %2147 = vmatprep.subr.bf16.mxu0 %v2430_v3 }
 0x327   :  { %v1042_v42 = vpop.permute.xlu1 %1041 }
 0x32b   :  { %v1163_v44 = vpop.permute.xlu1 %1162 }
 0x32c   :  { %2138 = vmatmul.mubr.msk.bf16.vlgmr.msra.gmra.mrb[12].mxu0 %vm318_vm1, %v800_v36 }
 0x32d   :  { %2148 = vmatpush3.bf16.xpose.msra.mxu0 %v928_v37  ;;  %2149 = vmatprep.mubr.msk.bf16.mxu0 %vm2431_vm0, %v2430_v3 }
 0x32e   :  { %2159 = vmatprep.subr.bf16.mxu0 %v2430_v3 }
 0x334   :  { %2150 = vmatmul.mubr.msk.bf16.vlgmr.msra.gmra.mrb[16].mxu0 %vm318_vm1, %v921_v39 }
 0x335   :  { %2160 = vmatpush3.bf16.xpose.msra.mxu0 %v1049_v40  ;;  %2161 = vmatprep.mubr.msk.bf16.mxu0 %vm2431_vm0, %v2430_v3 }
 0x336   :  { %2171 = vmatprep.subr.bf16.mxu0 %v2430_v3 }
 0x33c   :  { %2162 = vmatmul.mubr.msk.bf16.vlgmr.msra.gmra.mrb[20].mxu0 %vm318_vm1, %v1042_v42 }
 0x33d   :  { %2172 = vmatpush3.bf16.xpose.msra.mxu0 %v1170_v43  ;;  %2173 = vmatprep.mubr.msk.bf16.mxu0 %vm2431_vm0, %v2430_v3 }
 0x33e   :  { %2183 = vmatprep.subr.bf16.mxu0 %v2430_v3 }
 0x344   :  { %2174 = vmatmul.mubr.msk.bf16.vlgmr.msra.gmra.mrb[24].mxu0 %vm318_vm1, %v1163_v44 }
 0x345   :  { %2199 = vmatprep.mubr.msk.bf16.mxu0 %vm2431_vm0, %v2430_v3 }
 0x3ee   :  { %v2711_v45 = vpop.f32.mrb[8].mxu1 }
 0x3ef   :  { %v2097_v46 = vpop.f32.mrb[9].mxu1  ;;  %v601_v47 = vpop.f32.mrb[4].mxu0 }
 0x3f0   :  { %v2713_v48 = vpop.f32.mrb[10].mxu1  ;;  %v2115_v49 = vpop.f32.mrb[5].mxu0  ;;  %v2719_v62 = vadd.f32 %v601_v47, %v2639_v56 }
 0x3f1   :  { %v2098_v50 = vpop.f32.mrb[11].mxu1  ;;  %v604_v51 = vpop.f32.mrb[6].mxu0 }
 0x3f2   :  { %v2116_v52 = vpop.f32.mrb[7].mxu0  ;;  %v605_v8 = vadd.f32 %v604_v51, %v2644_v58  ;;  %v608_v9 = vsel %vm318_vm1, %v2719_v62, -inf }
 0x3f4   :  { %v611_v15 = vsel %vm318_vm1, %v605_v8, -inf }
 0x3f6   :  { %v479_v53 = vpop.f32.mrb[12].mxu1 }
 0x3f7   :  { %v2716_v54 = vadd.f32 %v479_v53, %v2639_v56  ;;  %v2103_v57 = vpop.f32.mrb[13].mxu1  ;;  %v722_v59 = vpop.f32.mrb[8].mxu0 }
 0x3f8   :  { %v482_v60 = vpop.f32.mrb[14].mxu1  ;;  %v2127_v61 = vpop.f32.mrb[9].mxu0  ;;  %v2737_v13 = vadd.f32 %v722_v59, %v2639_v56 }
 0x3f9   :  { %v2722_v63 = vadd.f32 %v482_v60, %v2644_v58  ;;  %v2104_v0 = vpop.f32.mrb[15].mxu1  ;;  %v725_v1 = vpop.f32.mrb[10].mxu0  ;;  %v486_v4 = vsel %vm318_vm1, %v2716_v54, -inf }
 0x3fa   :  { %v2128_v5 = vpop.f32.mrb[11].mxu0  ;;  %487 = vmax.xlane.f32.xlu0 %v486_v4  ;;  %v2727_v6 = vadd.f32 %v725_v1, %v2644_v58  ;;  %v729_v20 = vsel %vm318_vm1, %v2737_v13, -inf }
 0x3fb   :  { %v489_v7 = vsel %vm318_vm1, %v2722_v63, -inf }
 0x3fc   :  { %490 = vmax.xlane.f32.xlu1 %v489_v7  ;;  %v732_v11 = vsel %vm318_vm1, %v2727_v6, -inf }
 0x3fe   :  { %609 = vmax.xlane.f32.xlu0 %v608_v9 }
 0x3ff   :  { %v843_v10 = vpop.f32.mrb[12].mxu0 }
 0x400   :  { %v2139_v12 = vpop.f32.mrb[13].mxu0  ;;  %733 = vmax.xlane.f32.xlu1 %v732_v11  ;;  %v2743_v19 = vadd.f32 %v843_v10, %v2639_v56 }
 0x401   :  { %v846_v14 = vpop.f32.mrb[14].mxu0 }
 0x402   :  { %v847_v16 = vadd.f32 %v846_v14, %v2644_v58  ;;  %v2140_v17 = vpop.f32.mrb[15].mxu0  ;;  %612 = vmax.xlane.f32.xlu0 %v611_v15  ;;  %v850_v25 = vsel %vm318_vm1, %v2743_v19, -inf }
 0x404   :  { %v853_v18 = vsel %vm318_vm1, %v847_v16, -inf }
 0x405   :  { %854 = vmax.xlane.f32.xlu1 %v853_v18 }
 0x406   :  { %730 = vmax.xlane.f32.xlu0 %v729_v20 }
 0x407   :  { %v964_v21 = vpop.f32.mrb[16].mxu0 }
 0x408   :  { %v2151_v22 = vpop.f32.mrb[17].mxu0  ;;  %v2748_v23 = vadd.f32 %v964_v21, %v2639_v56 }
 0x409   :  { %v967_v24 = vpop.f32.mrb[18].mxu0 }
 0x40a   :  { %v2753_v26 = vadd.f32 %v967_v24, %v2644_v58  ;;  %v2152_v27 = vpop.f32.mrb[19].mxu0  ;;  %851 = vmax.xlane.f32.xlu0 %v850_v25  ;;  %v971_v29 = vsel %vm318_vm1, %v2748_v23, -inf }
 0x40c   :  { %v974_v28 = vsel %vm318_vm1, %v2753_v26, -inf }
 0x40d   :  { %975 = vmax.xlane.f32.xlu1 %v974_v28 }
 0x40e   :  { %972 = vmax.xlane.f32.xlu0 %v971_v29 }
 0x40f   :  { %v1085_v32 = vpop.f32.mrb[20].mxu0 }
 0x410   :  { %v2760_v34 = vadd.f32 %v1085_v32, %v2639_v56  ;;  %v2163_v35 = vpop.f32.mrb[21].mxu0 }
 0x411   :  { %v1088_v36 = vpop.f32.mrb[22].mxu0 }
 0x412   :  { %v2763_v37 = vadd.f32 %v1088_v36, %v2644_v58  ;;  %v2164_v38 = vpop.f32.mrb[23].mxu0  ;;  %v1092_v39 = vsel %vm318_vm1, %v2760_v34, -inf }
 0x413   :  { %1093 = vmax.xlane.f32.xlu0 %v1092_v39 }
 0x414   :  { %v1095_v40 = vsel %vm318_vm1, %v2763_v37, -inf }
 0x415   :  { %1096 = vmax.xlane.f32.xlu1 %v1095_v40 }
 0x417   :  { %v1206_v41 = vpop.f32.mrb[24].mxu0 }
 0x418   :  { %v2770_v42 = vadd.f32 %v1206_v41, %v2639_v56  ;;  %v2175_v43 = vpop.f32.mrb[25].mxu0 }
 0x419   :  { %v1209_v44 = vpop.f32.mrb[26].mxu0 }
 0x41a   :  { %v2773_v46 = vadd.f32 %v1209_v44, %v2644_v58  ;;  %v2176_v47 = vpop.f32.mrb[27].mxu0  ;;  %v1213_v49 = vsel %vm318_vm1, %v2770_v42, -inf }
 0x41b   :  { %1214 = vmax.xlane.f32.xlu0 %v1213_v49 }
 0x41c   :  { %v1216_v50 = vsel %vm318_vm1, %v2773_v46, -inf }
 0x41d   :  { %1217 = vmax.xlane.f32.xlu1 %v1216_v50 }
 0x487   :  { %v488_v51 = vpop.xlane.xlu0 %487 }
 0x488   :  { %v492_v10 = vsub.f32 %v2716_v54, %v488_v51 }
 0x489   :  { %v491_v52 = vpop.xlane.xlu1 %490 }
 0x48b   :  { %v610_v53 = vpop.xlane.xlu0 %609 }
 0x48c   :  { %v614_v56 = vsub.f32 %v2719_v62, %v610_v53 }
 0x48d   :  { %v734_v57 = vpop.xlane.xlu1 %733 }
 0x48e   :  { %v616_v59 = vmul.f32 1.442695, %v614_v56  ;;  %v736_v60 = vsub.f32 %v2727_v6, %v734_v57 }
 0x48f   :  { %v613_v58 = vpop.xlane.xlu0 %612 }
 0x490   :  { %2339 = vpow2.f32 %v616_v59  ;;  %v615_v61 = vsub.f32 %v605_v8, %v613_v58  ;;  %v739_v0 = vmul.f32 1.442695, %v736_v60  ;;  %v494_v8 = vmul.f32 1.442695, %v492_v10 }
 0x492   :  { %v618_v1 = vmul.f32 1.442695, %v615_v61  ;;  %v855_v4 = vpop.xlane.xlu1 %854 }
 0x493   :  { %v857_v5 = vsub.f32 %v847_v16, %v855_v4  ;;  %v731_v7 = vpop.xlane.xlu0 %730 }
 0x494   :  { %2341 = vpow2.f32 %v618_v1  ;;  %v735_v9 = vsub.f32 %v2737_v13, %v731_v7 }
 0x495   :  { %2343 = vpow2.f32 %v739_v0  ;;  %v860_v11 = vmul.f32 1.442695, %v857_v5 }
 0x496   :  { %v737_v62 = vmul.f32 1.442695, %v735_v9 }
 0x497   :  { %v852_v12 = vpop.xlane.xlu0 %851 }
 0x498   :  { %2345 = vpow2.f32 %v737_v62  ;;  %v856_v6 = vsub.f32 %v2743_v19, %v852_v12  ;;  %v493_v19 = vsub.f32 %v2722_v63, %v491_v52 }
 0x499   :  { %2347 = vpow2.f32 %v860_v11 }
 0x49a   :  { %v2784_v14 = vpop.eup %2339  ;;  %v858_v15 = vmul.f32 1.442695, %v856_v6  ;;  %v976_v17 = vpop.xlane.xlu1 %975  ;;  %v496_v27 = vmul.f32 1.442695, %v493_v19 }
 0x49b   :  { %v978_v16 = vsub.f32 %v2753_v26, %v976_v17  ;;  %v973_v18 = vpop.xlane.xlu0 %972  ;;  %v620_v13 = vsel %vm318_vm1, %v2784_v14, 0.0 }
 0x49c   :  { %2349 = vpow2.f32 %v858_v15  ;;  %v977_v54 = vsub.f32 %v2748_v23, %v973_v18  ;;  %621 = vadd.xlane.f32.xlu0 %v620_v13 }
 0x49d   :  { %2351 = vpow2.f32 %v494_v8  ;;  %v981_v21 = vmul.f32 1.442695, %v978_v16 }
 0x49e   :  { %v2790_v20 = vpop.eup %2341  ;;  %v979_v22 = vmul.f32 1.442695, %v977_v54 }
 0x49f   :  { %v623_v24 = vsel %vm318_vm1, %v2790_v20, 0.0  ;;  %v2795_v25 = vpop.eup %2343 }
 0x4a0   :  { %2353 = vpow2.f32 %v979_v22  ;;  %624 = vadd.xlane.f32.xlu1 %v623_v24  ;;  %v744_v28 = vsel %vm318_vm1, %v2795_v25, 0.0  ;;  %v1094_v49 = vpop.xlane.xlu0 %1093 }
 0x4a1   :  { %2355 = vpow2.f32 %v981_v21  ;;  %v1098_v50 = vsub.f32 %v2760_v34, %v1094_v49 }
 0x4a2   :  { %v2797_v26 = vpop.eup %2345  ;;  %2357 = vpow2.f32 %v496_v27  ;;  %v1097_v52 = vpop.xlane.xlu1 %1096 }
 0x4a3   :  { %v741_v23 = vsel %vm318_vm1, %v2797_v26, 0.0  ;;  %v2803_v63 = vpop.eup %2347  ;;  %v1100_v51 = vmul.f32 1.442695, %v1098_v50  ;;  %v1099_v53 = vsub.f32 %v2763_v37, %v1097_v52 }
 0x4a4   :  { %742 = vadd.xlane.f32.xlu0 %v741_v23  ;;  %745 = vadd.xlane.f32.xlu1 %v744_v28  ;;  %v865_v35 = vsel %vm318_vm1, %v2803_v63, 0.0 }
 0x4a5   :  { %2359 = vpow2.f32 %v1100_v51  ;;  %v1102_v57 = vmul.f32 1.442695, %v1099_v53 }
 0x4a6   :  { %v2805_v29 = vpop.eup %2349 }
 0x4a7   :  { %v862_v32 = vsel %vm318_vm1, %v2805_v29, 0.0  ;;  %v2811_v36 = vpop.eup %2351  ;;  %2361 = vpow2.f32 %v1102_v57 }
 0x4a8   :  { %863 = vadd.xlane.f32.xlu0 %v862_v32  ;;  %866 = vadd.xlane.f32.xlu1 %v865_v35  ;;  %v498_v39 = vsel %vm318_vm1, %v2811_v36, 0.0  ;;  %v1215_v56 = vpop.xlane.xlu0 %1214 }
 0x4a9   :  { %v1219_v59 = vsub.f32 %v2770_v42, %v1215_v56 }
 0x4aa   :  { %v2813_v38 = vpop.eup %2353  ;;  %v1218_v60 = vpop.xlane.xlu1 %1217 }
 0x4ab   :  { %v983_v40 = vsel %vm318_vm1, %v2813_v38, 0.0  ;;  %v2819_v41 = vpop.eup %2355  ;;  %v1221_v58 = vmul.f32 1.442695, %v1219_v59  ;;  %v1220_v61 = vsub.f32 %v2773_v46, %v1218_v60 }
 0x4ac   :  { %499 = vadd.xlane.f32.xlu0 %v498_v39  ;;  %984 = vadd.xlane.f32.xlu1 %v983_v40  ;;  %v986_v43 = vsel %vm318_vm1, %v2819_v41, 0.0  ;;  %v2823_v44 = vpop.eup %2357 }
 0x4ad   :  { %v501_v47 = vsel %vm318_vm1, %v2823_v44, 0.0  ;;  %2363 = vpow2.f32 %v1221_v58  ;;  %v1223_v1 = vmul.f32 1.442695, %v1220_v61 }
 0x4af   :  { %v2835_v0 = vpop.eup %2359  ;;  %2365 = vpow2.f32 %v1223_v1 }
 0x4b0   :  { %987 = vadd.xlane.f32.xlu1 %v986_v43  ;;  %v1104_v34 = vsel %vm318_vm1, %v2835_v0, 0.0 }
 0x4b1   :  { %v2839_v4 = vpop.eup %2361 }
 0x4b2   :  { %v1107_v37 = vsel %vm318_vm1, %v2839_v4, 0.0 }
 0x4b4   :  { %502 = vadd.xlane.f32.xlu1 %v501_v47 }
 0x4b7   :  { %v2843_v42 = vpop.eup %2363 }
 0x4b8   :  { %v1225_v46 = vsel %vm318_vm1, %v2843_v42, 0.0 }
 0x4b9   :  { %v2847_v5 = vpop.eup %2365 }
 0x4ba   :  { %v1228_v7 = vsel %vm318_vm1, %v2847_v5, 0.0 }
 0x4c2   :  { %510 = vrot.lane.b32.xlu0 %v2632_v55, %s2432_s21 }
 0x4c5   :  { %631 = vrot.lane.b32.xlu1 %v2632_v55, %s2438_s26 }
 0x4e1   :  { %1105 = vadd.xlane.f32.xlu0 %v1104_v34 }
 0x4e9   :  { %1108 = vadd.xlane.f32.xlu1 %v1107_v37 }
 0x4ed   :  { %1226 = vadd.xlane.f32.xlu1 %v1225_v46 }
 0x4f1   :  { %1229 = vadd.xlane.f32.xlu1 %v1228_v7 }
 0x4f7   :  { %752 = vrot.lane.b32.xlu0 %v2632_v55, %s2433_s22 }
 0x4fb   :  { %994 = vrot.lane.b32.xlu0 %v2632_v55, %s2435_s23 }
 0x4ff   :  { %1115 = vrot.lane.b32.xlu0 %v2632_v55, %s2436_s24 }
 0x502   :  { %873 = vrot.lane.b32.xlu1 %v2632_v55, %s2434_s1 }
 0x503   :  { %1236 = vrot.lane.b32.xlu0 %v2632_v55, %s2437_s25 }
 0x529   :  { %v622_v9 = vpop.xlane.xlu0 %621 }
 0x52d   :  { %v625_v10 = vpop.xlane.xlu1 %624 }
 0x531   :  { %v743_v11 = vpop.xlane.xlu0 %742  ;;  %v746_v62 = vpop.xlane.xlu1 %745 }
 0x535   :  { %v864_v12 = vpop.xlane.xlu0 %863  ;;  %v867_v6 = vpop.xlane.xlu1 %866 }
 0x536   :  { %2367 = vrcp.f32 %v864_v12 }
 0x537   :  { %2369 = vrcp.f32 %v867_v6 }
 0x539   :  { %v500_v8 = vpop.xlane.xlu0 %499  ;;  %v985_v15 = vpop.xlane.xlu1 %984 }
 0x53a   :  { %2371 = vrcp.f32 %v985_v15 }
 0x53d   :  { %v511_v17 = vpop.permute.xlu0 %510  ;;  %v988_v16 = vpop.xlane.xlu1 %987 }
 0x53e   :  { %2373 = vrcp.f32 %v988_v16  ;;  %2106 = vmatpush3.bf16.msra.mxu1 %v511_v17 }
 0x53f   :  { %2117 = vmatprep.subr.bf16.mxu1 %v2430_v3  ;;  %2375 = vrcp.f32 %v500_v8 }
 0x540   :  { %v2368_v18 = vpop.eup %2367 }
 0x541   :  { %v2370_v55 = vpop.eup %2369  ;;  %v870_v13 = vmul.f32 %v2368_v18, %v2805_v29  ;;  %v503_v54 = vpop.xlane.xlu1 %502 }
 0x542   :  { %v871_v19 = vmul.f32 %v2370_v55, %v2803_v63  ;;  %2377 = vrcp.f32 %v503_v54 }
 0x543   :  { %2379 = vrcp.f32 %v625_v10 }
 0x544   :  { %v872_v21 = vpack.c.bf16 %v871_v19, %v870_v13  ;;  %v2372_v22 = vpop.eup %2371  ;;  %2381 = vrcp.f32 %v622_v9  ;;  %v2284_v19 = vld [vmem:[%s3097_s4 + $0x8] sm:$0xff]  }
 0x545   :  { %v991_v27 = vmul.f32 %v2372_v22, %v2813_v38  ;;  %v632_v63 = vpop.permute.xlu1 %631  ;;  %2383 = vrcp.f32 %v743_v11 }
 0x546   :  { %2385 = vrcp.f32 %v746_v62 }
 0x548   :  { %v2374_v24 = vpop.eup %2373 }
 0x549   :  { %v992_v23 = vmul.f32 %v2374_v24, %v2819_v41  ;;  %v2376_v28 = vpop.eup %2375 }
 0x54a   :  { %v506_v39 = vmul.f32 %v2376_v28, %v2811_v36 }
 0x54b   :  { %v993_v32 = vpack.c.bf16 %v992_v23, %v991_v27  ;;  %v2286_v27 = vld [vmem:[%s3097_s4 + $0x18] sm:$0xff]  }
 0x54c   :  { %v2378_v35 = vpop.eup %2377 }
 0x54d   :  { %v507_v29 = vmul.f32 %v2378_v35, %v2823_v44  ;;  %v2380_v43 = vpop.eup %2379  ;;  %v2287_v35 = vld [vmem:[%s3097_s4 + $0x20] sm:$0xff]  }
 0x54e   :  { %v2382_v47 = vpop.eup %2381  ;;  %v629_v38 = vmul.f32 %v2380_v43, %v2790_v20 }
 0x54f   :  { %v508_v40 = vpack.c.bf16 %v507_v29, %v506_v39  ;;  %v628_v41 = vmul.f32 %v2382_v47, %v2784_v14  ;;  %v2384_v36 = vpop.eup %2383 }
 0x550   :  { %v2386_v44 = vpop.eup %2385  ;;  %v749_v51 = vmul.f32 %v2384_v36, %v2797_v26  ;;  %v2290_v36 = vld [vmem:[%s3097_s4 + $0x38] sm:$0xff]  }
 0x551   :  { %2108 = vmatmul.mubr.msk.bf16.vlgmr.msra.gmra.mrb[16].mxu1 %vm318_vm1, %v508_v40  ;;  %v630_v49 = vpack.c.bf16 %v629_v38, %v628_v41  ;;  %v750_v52 = vmul.f32 %v2386_v44, %v2795_v25  ;;  %v2288_v40 = vld [vmem:[%s3097_s4 + $0x28] sm:$0xff]   ;;  %v2289_v38 = vld [vmem:[%s3097_s4 + $0x30] sm:$0xff]  }
 0x552   :  { %2118 = vmatpush3.bf16.msra.mxu1 %v632_v63  ;;  %2119 = vmatprep.mubr.msk.bf16.mxu1 %vm2431_vm0, %v2430_v3 }
 0x553   :  { %2129 = vmatprep.subr.bf16.mxu1 %v2430_v3  ;;  %v751_v53 = vpack.c.bf16 %v750_v52, %v749_v51 }
 0x559   :  { %2120 = vmatmul.mubr.msk.bf16.vlgmr.msra.gmra.mrb[20].mxu1 %vm318_vm1, %v630_v49 }
 0x55a   :  { %2131 = vmatprep.mubr.msk.bf16.mxu1 %vm2431_vm0, %v2430_v3 }
 0x56e   :  { %v1106_v50 = vpop.xlane.xlu0 %1105 }
 0x572   :  { %v753_v20 = vpop.permute.xlu0 %752 }
 0x573   :  { %2130 = vmatpush3.bf16.msra.mxu1 %v753_v20 }
 0x574   :  { %2141 = vmatprep.subr.bf16.mxu1 %v2430_v3 }
 0x576   :  { %2132 = vmatmul.mubr.msk.bf16.vlgmr.msra.gmra.mrb[24].mxu1 %vm318_vm1, %v751_v53  ;;  %v1109_v14 = vpop.xlane.xlu1 %1108  ;;  %v995_v25 = vpop.permute.xlu0 %994 }
 0x577   :  { %2143 = vmatprep.mubr.msk.bf16.mxu1 %vm2431_vm0, %v2430_v3  ;;  %2387 = vrcp.f32 %v1109_v14 }
 0x578   :  { %2389 = vrcp.f32 %v1106_v50 }
 0x57a   :  { %v1227_v56 = vpop.xlane.xlu1 %1226  ;;  %v1116_v60 = vpop.permute.xlu0 %1115 }
 0x57e   :  { %v1230_v57 = vpop.xlane.xlu1 %1229  ;;  %v1237_v46 = vpop.permute.xlu0 %1236 }
 0x57f   :  { %2391 = vrcp.f32 %v1230_v57 }
 0x580   :  { %2393 = vrcp.f32 %v1227_v56 }
 0x581   :  { %v2388_v26 = vpop.eup %2387 }
 0x582   :  { %v874_v59 = vpop.permute.xlu1 %873  ;;  %v2390_v58 = vpop.eup %2389  ;;  %v1113_v61 = vmul.f32 %v2388_v26, %v2839_v4 }
 0x583   :  { %2142 = vmatpush3.bf16.msra.mxu1 %v874_v59  ;;  %v1112_v1 = vmul.f32 %v2390_v58, %v2835_v0 }
 0x584   :  { %2153 = vmatprep.subr.bf16.mxu1 %v2430_v3 }
 0x585   :  { %v1114_v34 = vpack.c.bf16 %v1113_v61, %v1112_v1 }
 0x586   :  { %2144 = vmatmul.mubr.msk.bf16.vlgmr.msra.gmra.mrb[28].mxu1 %vm318_vm1, %v872_v21  ;;  %v2285_v21 = vld [vmem:[%s3097_s4 + $0x10] sm:$0xff]  }
 0x587   :  { %2154 = vmatpush3.bf16.msra.mxu1 %v995_v25  ;;  %2155 = vmatprep.mubr.msk.bf16.mxu1 %vm2431_vm0, %v2430_v3 }
 0x588   :  { %2165 = vmatprep.subr.bf16.mxu1 %v2430_v3 }
 0x589   :  { %v2392_v37 = vpop.eup %2391 }
 0x58a   :  { %v2394_v7 = vpop.eup %2393  ;;  %v1234_v9 = vmul.f32 %v2392_v37, %v2847_v5 }
 0x58b   :  { %v1233_v10 = vmul.f32 %v2394_v7, %v2843_v42  ;;  %v2283_v42 = vld [vmem:[%s3097_s4] sm:$0xff]  }
 0x58c   :  { %2184 = vmatpush3.bf16.msra.mxu0 %v2283_v42 }
 0x58d   :  { %v1235_v11 = vpack.c.bf16 %v1234_v9, %v1233_v10  ;;  %2185 = vmatprep.subr.bf16.mxu0 %v2430_v3 }
 0x58e   :  { %2156 = vmatmul.mubr.msk.bf16.vlgmr.msra.gmra.mrb[32].mxu1 %vm318_vm1, %v993_v32 }
 0x58f   :  { %2166 = vmatpush3.bf16.msra.mxu1 %v1116_v60  ;;  %2167 = vmatprep.mubr.msk.bf16.mxu1 %vm2431_vm0, %v2430_v3 }
 0x590   :  { %2177 = vmatprep.subr.bf16.mxu1 %v2430_v3  ;;  %2186 = vmatpush3.bf16.msra.mxu0 %v2284_v19 }
 0x591   :  { %2187 = vmatprep.subr.bf16.mxu0 %v2430_v3 }
 0x594   :  { %2188 = vmatpush3.bf16.msra.mxu0 %v2285_v21 }
 0x595   :  { %2189 = vmatprep.subr.bf16.mxu0 %v2430_v3 }
 0x596   :  { %2168 = vmatmul.mubr.msk.bf16.vlgmr.msra.gmra.mrb[36].mxu1 %vm318_vm1, %v1114_v34 }
 0x597   :  { %2178 = vmatpush3.bf16.msra.mxu1 %v1237_v46  ;;  %2179 = vmatprep.mubr.msk.bf16.mxu1 %vm2431_vm0, %v2430_v3 }
 0x598   :  { %2190 = vmatpush3.bf16.msra.mxu0 %v2286_v27 }
 0x599   :  { %2191 = vmatprep.subr.bf16.mxu0 %v2430_v3 }
 0x59c   :  { %2192 = vmatpush3.bf16.msra.mxu0 %v2287_v35 }
 0x59d   :  { %2193 = vmatprep.subr.bf16.mxu0 %v2430_v3 }
 0x59e   :  { %2180 = vmatmul.mubr.msk.bf16.vlgmr.msra.gmra.mrb[40].mxu1 %vm318_vm1, %v1235_v11 }
 0x59f   :  { %1656 = vmatprep.mubr.bf16.mxu1 %v2429_v2 }
 0x5a0   :  { %2194 = vmatpush3.bf16.msra.mxu0 %v2288_v40  ;;  %v2404_v40 = vld [vmem:[%s3093_s0 + $0x8] sm:$0xff] }
 0x5a1   :  { %2195 = vmatprep.subr.bf16.mxu0 %v2430_v3 }
 0x5a4   :  { %2196 = vmatpush3.bf16.msra.mxu0 %v2289_v38  ;;  %v2296_v38 = vld [vmem:[%s3101_s8 + $0x14] ss:$8 sps:$4 sm:$0xff]  }
 0x5a5   :  { %2197 = vmatprep.subr.bf16.mxu0 %v2430_v3 }
 0x5a8   :  { %2198 = vmatpush3.bf16.msra.mxu0 %v2290_v36 }
 0x624   :  { %v550_v0 = vpop.f32.mrb[16].mxu1 }
 0x625   :  { %v2109_v4 = vpop.f32.mrb[17].mxu1 }
 0x626   :  { %v553_v62 = vpop.f32.mrb[18].mxu1 }
 0x627   :  { %v2216_v12 = vpack.i.bf16 %v553_v62, %v550_v0  ;;  %v2110_v6 = vpop.f32.mrb[19].mxu1 }
 0x629   :  { %2217 = vrot.lane.b32.xlu1 %v2216_v12, %s2437_s25 }
 0x62c   :  { %v671_v8 = vpop.f32.mrb[20].mxu1 }
 0x62d   :  { %v2121_v15 = vpop.f32.mrb[21].mxu1 }
 0x62e   :  { %v674_v17 = vpop.f32.mrb[22].mxu1 }
 0x62f   :  { %v2221_v16 = vpack.i.bf16 %v674_v17, %v671_v8  ;;  %v2122_v18 = vpop.f32.mrb[23].mxu1 }
 0x631   :  { %2222 = vrot.lane.b32.xlu0 %v2221_v16, %s2436_s24 }
 0x649   :  { %v792_v2 = vpop.f32.mrb[24].mxu1 }
 0x64a   :  { %v2133_v5 = vpop.f32.mrb[25].mxu1 }
 0x64b   :  { %v795_v55 = vpop.f32.mrb[26].mxu1 }
 0x64c   :  { %v2226_v13 = vpack.i.bf16 %v795_v55, %v792_v2  ;;  %v2134_v54 = vpop.f32.mrb[27].mxu1 }
 0x64e   :  { %2227 = vrot.lane.b32.xlu1 %v2226_v13, %s2435_s23 }
 0x659   :  { %v913_v22 = vpop.f32.mrb[28].mxu1 }
 0x65a   :  { %v2145_v24 = vpop.f32.mrb[29].mxu1 }
 0x65b   :  { %v916_v23 = vpop.f32.mrb[30].mxu1 }
 0x65c   :  { %v2231_v28 = vpack.i.bf16 %v916_v23, %v913_v22  ;;  %v2146_v32 = vpop.f32.mrb[31].mxu1  ;;  %v1949_v22 = vld [vmem:[%s3098_s5] ss:$0 sm:$0xff] }
 0x65e   :  { %2232 = vrot.lane.b32.xlu0 %v2231_v28, %s2434_s1 }
 0x661   :  { %v1034_v39 = vpop.f32.mrb[32].mxu1 }
 0x662   :  { %v2157_v29 = vpop.f32.mrb[33].mxu1 }
 0x663   :  { %v1037_v43 = vpop.f32.mrb[34].mxu1 }
 0x664   :  { %v2236_v63 = vpack.i.bf16 %v1037_v43, %v1034_v39  ;;  %v2158_v47 = vpop.f32.mrb[35].mxu1  ;;  %v2403_v39 = vld [vmem:[%s3093_s0] sm:$0xff] }
 0x665   :  { %v2293_v47 = vld [vmem:[%s3101_s8 + $0x4] ss:$8 sps:$4 sm:$0xff]  }
 0x666   :  { %2237 = vrot.lane.b32.xlu1 %v2236_v63, %s2433_s22  ;;  %v2291_v63 = vld [vmem:[%s3101_s8] ss:$8 sps:$4 sm:$0xff]   ;;  %1624 = vmatprep.subr.bf16.mxu1 %v2293_v47 }
 0x667   :  { %1625 = vmatpush1.bf16.msra.mxu1 %v2291_v63 }
 0x668   :  { %1626 = vmatprep.subr.bf16.mxu1 %v2296_v38 }
 0x669   :  { %v1155_v41 = vpop.f32.mrb[36].mxu1 }
 0x66a   :  { %v2169_v49 = vpop.f32.mrb[37].mxu1 }
 0x66b   :  { %v1158_v44 = vpop.f32.mrb[38].mxu1 }
 0x66c   :  { %v2241_v50 = vpack.i.bf16 %v1158_v44, %v1155_v41  ;;  %v2170_v51 = vpop.f32.mrb[39].mxu1  ;;  %v2294_v41 = vld [vmem:[%s3101_s8 + $0x10] ss:$8 sps:$4 sm:$0xff]  }
 0x66d   :  { %1627 = vmatpush1.bf16.msra.mxu1 %v2294_v41 }
 0x66e   :  { %2242 = vrot.lane.b32.xlu0 %v2241_v50, %s2438_s26 }
 0x671   :  { %v1276_v52 = vpop.f32.mrb[40].mxu1 }
 0x672   :  { %v2181_v20 = vpop.f32.mrb[41].mxu1 }
 0x673   :  { %v1279_v53 = vpop.f32.mrb[42].mxu1 }
 0x674   :  { %v2246_v14 = vpack.i.bf16 %v1279_v53, %v1276_v52  ;;  %v2182_v56 = vpop.f32.mrb[43].mxu1 }
 0x675   :  { %v2297_v56 = vld [vmem:[%s3101_s8 + $0x20] ss:$8 sps:$4 sm:$0xff]  }
 0x676   :  { %2247 = vrot.lane.b32.xlu1 %v2246_v14, %s2432_s21  ;;  %v2299_v14 = vld [vmem:[%s3101_s8 + $0x24] ss:$8 sps:$4 sm:$0xff]  }
 0x677   :  { %1628 = vmatprep.subr.bf16.mxu1 %v2299_v14 }
 0x678   :  { %1629 = vmatpush1.bf16.msra.mxu1 %v2297_v56 }
 0x69b   :  { %v2218_v57 = vpop.permute.xlu1 %2217 }
 0x69c   :  { %v2220_v26 = vunpack.i.h.bf16 %v2218_v57  ;;  %v2219_v60 = vunpack.i.l.bf16 %v2218_v57  ;;  %v2302_v57 = vld [vmem:[%s3101_s8 + $0x34] ss:$8 sps:$4 sm:$0xff]  }
 0x69d   :  { %1630 = vmatprep.subr.bf16.mxu1 %v2302_v57 }
 0x69e   :  { %v1340_v10 = vsel %vm318_vm1, %v2713_v48, %v2220_v26  ;;  %v1339_v11 = vsel %vm318_vm1, %v2711_v45, %v2219_v60  ;;  %v2308_v26 = vld [vmem:[%s3101_s8 + $0x54] ss:$8 sps:$4 sm:$0xff]   ;;  %v2306_v60 = vld [vmem:[%s3101_s8 + $0x50] ss:$8 sps:$4 sm:$0xff]  }
 0x6a3   :  { %v2223_v3 = vpop.permute.xlu0 %2222 }
 0x6a4   :  { %v2225_v58 = vunpack.i.h.bf16 %v2223_v3  ;;  %v2224_v61 = vunpack.i.l.bf16 %v2223_v3  ;;  %v2300_v3 = vld [vmem:[%s3101_s8 + $0x30] ss:$8 sps:$4 sm:$0xff]  }
 0x6a5   :  { %1631 = vmatpush1.bf16.msra.mxu1 %v2300_v3 }
 0x6a6   :  { %v1343_v62 = vsel %vm1341_vm2, %v1340_v10, %v2225_v58  ;;  %v1342_v12 = vsel %vm1341_vm2, %v1339_v11, %v2224_v61  ;;  %v2311_v58 = vld [vmem:[%s3101_s8 + $0x64] ss:$8 sps:$4 sm:$0xff]   ;;  %v2309_v61 = vld [vmem:[%s3101_s8 + $0x60] ss:$8 sps:$4 sm:$0xff]   ;;  %v2319_v10 = vld [vmem:[%s3103_s10 + $0x50] sm:$0xff]  }
 0x6a7   :  { %v2320_v11 = vld [vmem:[%s3103_s10 + $0x10] sm:$0xff]  }
 0x6c0   :  { %v2228_v59 = vpop.permute.xlu1 %2227 }
 0x6c1   :  { %v2230_v34 = vunpack.i.h.bf16 %v2228_v59  ;;  %v2229_v37 = vunpack.i.l.bf16 %v2228_v59  ;;  %v2305_v59 = vld [vmem:[%s3101_s8 + $0x44] ss:$8 sps:$4 sm:$0xff]  }
 0x6c2   :  { %1632 = vmatprep.subr.bf16.mxu1 %v2305_v59 }
 0x6c3   :  { %v1346_v15 = vsel %vm1344_vm3, %v1343_v62, %v2230_v34  ;;  %v1345_v17 = vsel %vm1344_vm3, %v1342_v12, %v2229_v37  ;;  %v2312_v34 = vld [vmem:[%s3101_s8 + $0x70] ss:$8 sps:$4 sm:$0xff]   ;;  %v2315_v37 = vld [vmem:[%s3103_s10 + $0x40] sm:$0xff]  }
 0x6c4   :  { %2045 = vmatprep.subr.bf16.mxu0 %v2315_v37  ;;  %v2323_v62 = vld [vmem:[%s3103_s10 + $0x60] sm:$0xff]  }
 0x6c5   :  { %v2324_v12 = vld [vmem:[%s3103_s10 + $0x20] sm:$0xff]  }
 0x6d0   :  { %v2233_v25 = vpop.permute.xlu0 %2232 }
 0x6d1   :  { %v2235_v7 = vunpack.i.h.bf16 %v2233_v25  ;;  %v2234_v9 = vunpack.i.l.bf16 %v2233_v25  ;;  %v2303_v25 = vld [vmem:[%s3101_s8 + $0x40] ss:$8 sps:$4 sm:$0xff]  }
 0x6d2   :  { %1633 = vmatpush1.bf16.msra.mxu1 %v2303_v25 }
 0x6d3   :  { %v1349_v16 = vsel %vm1347_vm4, %v1346_v15, %v2235_v7  ;;  %v1348_v18 = vsel %vm1347_vm4, %v1345_v17, %v2234_v9  ;;  %1634 = vmatprep.subr.bf16.mxu1 %v2308_v26  ;;  %v2317_v7 = vld [vmem:[%s3103_s10 + $0x48] sm:$0xff]  }
 0x6d4   :  { %v2318_v9 = vld [vmem:[%s3103_s10 + $0x8] sm:$0xff]  }
 0x6d6   :  { %1635 = vmatpush1.bf16.msra.mxu1 %v2306_v60 }
 0x6d7   :  { %1636 = vmatprep.subr.bf16.mxu1 %v2311_v58 }
 0x6d8   :  { %v2238_v1 = vpop.permute.xlu1 %2237 }
 0x6d9   :  { %v2240_v0 = vunpack.i.h.bf16 %v2238_v1  ;;  %v2239_v4 = vunpack.i.l.bf16 %v2238_v1  ;;  %v2314_v1 = vld [vmem:[%s3101_s8 + $0x74] ss:$8 sps:$4 sm:$0xff]  }
 0x6da   :  { %1637 = vmatpush1.bf16.msra.mxu1 %v2309_v61 }
 0x6db   :  { %v1352_v42 = vsel %vm1350_vm5, %v1349_v16, %v2240_v0  ;;  %v1351_v45 = vsel %vm1350_vm5, %v1348_v18, %v2239_v4  ;;  %1638 = vmatprep.subr.bf16.mxu1 %v2314_v1  ;;  %v2321_v0 = vld [vmem:[%s3103_s10 + $0x58] sm:$0xff]  }
 0x6dc   :  { %v2322_v4 = vld [vmem:[%s3103_s10 + $0x18] sm:$0xff]  }
 0x6de   :  { %1639 = vmatpush1.bf16.msra.mxu1 %v2312_v34 }
 0x6e0   :  { %v2243_v46 = vpop.permute.xlu0 %2242 }
 0x6e1   :  { %v2245_v6 = vunpack.i.h.bf16 %v2243_v46  ;;  %v2244_v8 = vunpack.i.l.bf16 %v2243_v46  ;;  %v2316_v46 = vld [vmem:[%s3103_s10] sm:$0xff]  }
 0x6e3   :  { %v1355_v55 = vsel %vm1353_vm6, %v1352_v42, %v2245_v6  ;;  %v1354_v13 = vsel %vm1353_vm6, %v1351_v45, %v2244_v8  ;;  %v2325_v6 = vld [vmem:[%s3103_s10 + $0x68] sm:$0xff]  }
 0x6e8   :  { %v2248_v48 = vpop.permute.xlu1 %2247 }
 0x6e9   :  { %v2250_v2 = vunpack.i.h.bf16 %v2248_v48  ;;  %v2249_v5 = vunpack.i.l.bf16 %v2248_v48 }
 0x6eb   :  { %v1358_v54 = vsel %vm1356_vm7, %v1355_v55, %v2250_v2  ;;  %v1357_v19 = vsel %vm1356_vm7, %v1354_v13, %v2249_v5  ;;  %v1958_v2 = vld [vmem:[%s3099_s6] ss:$0 sm:$0xff] }
 0x6ec   :  { %v1359_v21 = vpack.c.bf16 %v1358_v54, %v1357_v19  ;;  %v1959_v54 = vld [vmem:[%s3100_s7] ss:$0 sm:$0xff] }
 0x6ee   :  { %2200 = vmatmul.mubr.bf16.vlgmr.msra.gmra.mrb[28].mxu0 %v1359_v21 }
 0x6ef   :  { %2046 = vmatpush3.bf16.msra.mxu0 %v2316_v46 }
 0x6f0   :  { %2047 = vmatprep.subr.bf16.mxu0 %v2317_v7 }
 0x6f3   :  { %2048 = vmatpush3.bf16.msra.mxu0 %v2318_v9 }
 0x6f4   :  { %2049 = vmatprep.subr.bf16.mxu0 %v2319_v10 }
 0x6f7   :  { %2050 = vmatpush3.bf16.msra.mxu0 %v2320_v11 }
 0x6f8   :  { %2051 = vmatprep.subr.bf16.mxu0 %v2321_v0 }
 0x6fb   :  { %2052 = vmatpush3.bf16.msra.mxu0 %v2322_v4 }
 0x6fc   :  { %2053 = vmatprep.subr.bf16.mxu0 %v2323_v62 }
 0x6ff   :  { %2054 = vmatpush3.bf16.msra.mxu0 %v2324_v12 }
 0x700   :  { %2055 = vmatprep.subr.bf16.mxu0 %v2325_v6 }
 0x7c1   :  { %v1465_v24 = vpop.f32.mrb[28].mxu0 }
 0x7c2   :  { %v1466_v27 = vadd.f32 %v1949_v22, %v1465_v24  ;;  %v2201_v23 = vpop.f32.mrb[29].mxu0 }
 0x7c3   :  { %v1468_v28 = vpop.f32.mrb[30].mxu0  ;;  %v2327_v23 = vld [vmem:[%s3103_s10 + $0x70] sm:$0xff]  }
 0x7c4   :  { %v1469_v32 = vadd.f32 %v1949_v22, %v1468_v28  ;;  %v2202_v35 = vpop.f32.mrb[31].mxu0  ;;  %v1472_v29 = vadd.f32 %v2403_v39, %v1466_v27  ;;  %v2326_v27 = vld [vmem:[%s3103_s10 + $0x28] sm:$0xff]   ;;  %v2328_v28 = vld [vmem:[%s3103_s10 + $0x30] sm:$0xff]   ;;  %v1532_v39 = vld [vmem:[%s3102_s9] sm:$0x3] }
 0x7c5   :  { %2056 = vmatpush3.bf16.msra.mxu0 %v2326_v27  ;;  %v2330_v35 = vld [vmem:[%s3103_s10 + $0x38] sm:$0xff]  }
 0x7c6   :  { %1474 = vadd.xlane.f32.xlu0 %v1472_v29  ;;  %v1473_v43 = vadd.f32 %v2404_v40, %v1469_v32  ;;  %2057 = vmatprep.subr.bf16.mxu0 %v2327_v23  ;;  %v2329_v32 = vld [vmem:[%s3103_s10 + $0x78] sm:$0xff]   ;;  %v1541_v40 = vrot.slane %v1532_v39, %v92_v33 }
 0x7c8   :  { %1476 = vadd.xlane.f32.xlu1 %v1473_v43 }
 0x7c9   :  { %2058 = vmatpush3.bf16.msra.mxu0 %v2328_v28 }
 0x7ca   :  { %2059 = vmatprep.subr.bf16.mxu0 %v2329_v32 }
 0x7cd   :  { %2060 = vmatpush3.bf16.msra.mxu0 %v2330_v35 }
 0x853   :  { %v1475_v49 = vpop.xlane.xlu0 %1474 }
 0x854   :  { %v1479_v36 = vmul.f32 0.0078125, %v1475_v49 }
 0x855   :  { %v1477_v44 = vpop.xlane.xlu1 %1476 }
 0x856   :  { %v1481_v50 = vsub.f32 %v1472_v29, %v1479_v36  ;;  %v1480_v51 = vmul.f32 0.0078125, %v1477_v44  ;;  %v1537_v29 = vrot.slane %v1532_v39, %v88_v31 }
 0x858   :  { %v2970_v52 = vsub.f32 %v1473_v43, %v1480_v51  ;;  %v1483_v20 = vmul.f32 %v1481_v50, %v1481_v50 }
 0x85a   :  { %1485 = vadd.xlane.f32.xlu0 %v1483_v20  ;;  %v1484_v53 = vmul.f32 %v2970_v52, %v2970_v52 }
 0x85e   :  { %1487 = vadd.xlane.f32.xlu0 %v1484_v53 }
 0x8e7   :  { %v1486_v8 = vpop.xlane.xlu0 %1485 }
 0x8e8   :  { %v1489_v15 = vmul.f32 0.0078125, %v1486_v8 }
 0x8ea   :  { %v1491_v17 = vadd.f32 1e-05, %v1489_v15  ;;  %v1993_v15 = vld [vmem:[%s3105_s12] ss:$0 sm:$0xff] }
 0x8eb   :  { %v1488_v16 = vpop.xlane.xlu0 %1487 }
 0x8ec   :  { %2395 = vrsqrt.f32 %v1491_v17  ;;  %v1490_v18 = vmul.f32 0.0078125, %v1488_v16 }
 0x8ee   :  { %v1492_v48 = vadd.f32 1e-05, %v1490_v18  ;;  %v1994_v18 = vld [vmem:[%s3106_s13] ss:$0 sm:$0xff] }
 0x8f0   :  { %2397 = vrsqrt.f32 %v1492_v48 }
 0x8f6   :  { %v2396_v42 = vpop.eup %2395 }
 0x8f7   :  { %v1495_v45 = vmul.f32 %v2396_v42, %v1481_v50 }
 0x8f9   :  { %v1504_v13 = vmul.f32 %v1958_v2, %v1495_v45 }
 0x8fa   :  { %v2398_v5 = vpop.eup %2397 }
 0x8fb   :  { %v1496_v55 = vmul.f32 %v2398_v5, %v2970_v52  ;;  %v1513_v21 = vadd.f32 %v1959_v54, %v1504_v13 }
 0x8fd   :  { %v1505_v19 = vmul.f32 %v1958_v2, %v1496_v55 }
 0x8ff   :  { %v1514_v22 = vadd.f32 %v1959_v54, %v1505_v19 }
 0x901   :  { %v1515_v24 = vpack.c.bf16 %v1514_v22, %v1513_v21 }
 0x903   :  { %1657 = vmatmul.mubr.bf16.vlgmr.msra.gmra.mrb[44].mxu1 %v1515_v24 }
 0x9d6   :  { %v1658_v43 = vpop.f32.mrb[44].mxu1 }
 0x9d7   :  { %v1659_v63 = vadd.f32 %v1658_v43, %v1537_v29  ;;  %v1660_v47 = vpop.f32.mrb[45].mxu1 }
 0x9d8   :  { %v1661_v38 = vadd.f32 %v1660_v47, %v1541_v40  ;;  %v1662_v41 = vpop.f32.mrb[46].mxu1 }
 0x9d9   :  { %v1663_v49 = vadd.f32 %v1662_v41, %v1537_v29  ;;  %v1664_v36 = vpop.f32.mrb[47].mxu1  ;;  %v1667_v50 = vmax.f32 %v1659_v63, 0.0 }
 0x9da   :  { %v1665_v44 = vadd.f32 %v1664_v36, %v1541_v40  ;;  %v1668_v52 = vmax.f32 %v1661_v38, 0.0 }
 0x9db   :  { %v1669_v51 = vmax.f32 %v1663_v49, 0.0 }
 0x9dc   :  { %v1670_v20 = vmax.f32 %v1665_v44, 0.0 }
 0x9dd   :  { %v1671_v53 = vpack.c.bf16 %v1669_v51, %v1667_v50 }
 0x9de   :  { %v1672_v14 = vpack.c.bf16 %v1670_v20, %v1668_v52 }
 0x9e0   :  { %1840 = vmatprep.mubr.bf16.mxu0 %v1672_v14 }
 0x9e1   :  { %1841 = vmatmul.mubr.bf16.vlgmr.msra.gmra.mrb[32].mxu0 %v1671_v53 }
 0xab4   :  { %v2061_v31 = vpop.f32.mrb[32].mxu0 }
 0xab5   :  { %v2062_v33 = vpop.f32.mrb[33].mxu0 }
 0xab6   :  { %v2063_v56 = vadd.f32 %v2062_v33, %v2061_v31  ;;  %v2064_v57 = vpop.f32.mrb[34].mxu0 }
 0xab7   :  { %v2065_v3 = vpop.f32.mrb[35].mxu0 }
 0xab8   :  { %v1843_v59 = vadd.f32 %v2063_v56, %v1976_v30  ;;  %v2066_v25 = vadd.f32 %v2065_v3, %v2064_v57 }
 0xaba   :  { %v1846_v26 = vadd.f32 %v2066_v25, %v1976_v30  ;;  %v1849_v60 = vadd.f32 %v1843_v59, %v1513_v21 }
 0xabc   :  { %1851 = vadd.xlane.f32.xlu0 %v1849_v60  ;;  %v1850_v58 = vadd.f32 %v1846_v26, %v1514_v22 }
 0xabe   :  { %1853 = vadd.xlane.f32.xlu1 %v1850_v58 }
 0xb49   :  { %v1852_v61 = vpop.xlane.xlu0 %1851 }
 0xb4a   :  { %v1855_v1 = vmul.f32 0.0078125, %v1852_v61 }
 0xb4b   :  { %v1854_v34 = vpop.xlane.xlu1 %1853 }
 0xb4c   :  { %v1857_v37 = vsub.f32 %v1849_v60, %v1855_v1  ;;  %v1856_v46 = vmul.f32 0.0078125, %v1854_v34 }
 0xb4e   :  { %v1858_v7 = vsub.f32 %v1850_v58, %v1856_v46  ;;  %v1859_v9 = vmul.f32 %v1857_v37, %v1857_v37 }
 0xb50   :  { %1861 = vadd.xlane.f32.xlu0 %v1859_v9  ;;  %v1860_v10 = vmul.f32 %v1858_v7, %v1858_v7 }
 0xb52   :  { %1863 = vadd.xlane.f32.xlu1 %v1860_v10 }
 0xbdd   :  { %v1862_v11 = vpop.xlane.xlu0 %1861 }
 0xbde   :  { %v1865_v0 = vmul.f32 0.0078125, %v1862_v11 }
 0xbdf   :  { %v1864_v4 = vpop.xlane.xlu1 %1863 }
 0xbe0   :  { %v1867_v62 = vadd.f32 1e-05, %v1865_v0  ;;  %v1866_v12 = vmul.f32 0.0078125, %v1864_v4 }
 0xbe2   :  { %2399 = vrsqrt.f32 %v1867_v62  ;;  %v1868_v6 = vadd.f32 1e-05, %v1866_v12 }
 0xbe4   :  { %2401 = vrsqrt.f32 %v1868_v6 }
 0xbec   :  { %v2400_v8 = vpop.eup %2399 }
 0xbed   :  { %v1871_v17 = vmul.f32 %v2400_v8, %v1857_v37 }
 0xbee   :  { %v2402_v16 = vpop.eup %2401 }
 0xbef   :  { %v1872_v48 = vmul.f32 %v2402_v16, %v1858_v7  ;;  %v1880_v42 = vmul.f32 %v1993_v15, %v1871_v17 }
 0xbf1   :  { %v1881_v45 = vmul.f32 %v1993_v15, %v1872_v48  ;;  %v1889_v2 = vadd.f32 %v1994_v18, %v1880_v42 }
 0xbf3   :  { %v1890_v5 = vadd.f32 %v1994_v18, %v1881_v45  ;;  %1891 = vst [vmem:[#allocation2] sm:$0xff] %v1889_v2 }
 0xbf5   :  { %1892 = vst [vmem:[#allocation2 + $0x8] sm:$0xff] %v1890_v5 }
 0xbf6   :  { %2416 = shalt.err (!%p2413_p4)
}
 0xbf7   :  { %s2417_s13 = scalar_lea.hbm %s3107_s14, 256 }
 0xbf8   :  { %p2418_p5 = scmp.ne.s32.totalorder %s3107_s14, %s2417_s13  ;;  %p2421_p6 = scmp.lt.u32.totalorder %s2417_s13, %s3107_s14 }
 0xbfa   :  { %p2423_p7 = pnand %p2421_p6, %p2418_p5 }
 0xbfc   :  { %2426 = shalt.err (!%p2423_p7)
}
 0xbfd   :  { %s2440_s20 = smov 128   ;;  %s2441_s23 = smov 8  }
 0xbfe   :  { %1904 = dma.vmem_to_hbm [thread:$0]  %s1899_s16, 256, %s3107_s14, [#allocation3], %s2440_s20, %s2440_s20, %s2441_s23  }
 0xbff   :  { %2427 = dma.done.wait [#allocation3], 256  }
 0xc00   :  { %2428 = vsyncadd [#allocation3], 4294967040 }
 0xc01   :  { %1908 = vsyncpa [#allocation3], 1 }

</bundles_post_ra>
